<compile_context>
chip_gen: v7x
topology: tpu7x:2x2x1
jax: 0.10.0
libtpu: 0.0.40
codegen_flags: <defaults>
</compile_context>

<pallas_src>
import jax
import jax.numpy as jnp
import numpy as np
from jax import lax
from jax.experimental import pallas as pl
from jax.experimental.pallas import tpu as pltpu

EPS = 1e-5  # BatchNorm2d default eps


def _bgnorm(t, gamma, beta):
    # BGNorm(groups=1), train mode: BatchNorm2d(num_features=1) on the (N,1,C,H*W)
    # view => statistics over ALL elements, scalar gamma/beta (biased variance).
    # Single reduction pass: sum + sum-of-squares, then a fused scale/shift.
    n = t.size
    s1 = jnp.sum(t)
    s2 = jnp.sum(t * t)
    mu = s1 / n
    var = jnp.maximum(s2 / n - mu * mu, 0.0)      # clamp guards E[x^2]-E[x]^2 cancellation
    scale = lax.rsqrt(var + EPS) * gamma
    return t * scale + (beta - mu * scale)


def _prelu(t, a):
    return jnp.where(t > 0, t, a * t)


def resblock_kernel(scal_ref, x_ref, w1_ref, b1_ref, w2_ref, b2_ref,
                    wr_ref, br_ref, o_ref):
    N, H, _ = x_ref.shape
    x2 = x_ref[...].reshape(N * H, -1)            # (N*H, W*Cin) f32, lane-packed

    def conv3x3(t2, w_ref, b_ref):
        # Reflect-padded 3x3 conv as ONE deep-K bf16 MXU matmul:
        #   cast to bf16 once -> H reflect-pad once -> lane-concat the 3 row-shifted
        #   views into (N*H, 3*W*Cin) -> dot against the stacked W-block-Toeplitz
        #   weight (3*W*Cin, W*Cout) -> add bias.  W reflect padding is baked into
        #   the Toeplitz weight; no per-tap im2col and no per-tap casts.
        wcin = t2.shape[-1]
        t3 = t2.astype(jnp.bfloat16).reshape(N, H, wcin)                    # cast once
        tp = jnp.concatenate([t3[:, 1:2], t3, t3[:, H - 2:H - 1]], axis=1)  # (N,H+2,WCin)
        rows = jnp.concatenate([tp[:, ky:ky + H, :] for ky in range(3)],
                               axis=-1).reshape(N * H, 3 * wcin)            # (N*H,3WCin)
        return jnp.dot(rows, w_ref[...],
                       preferred_element_type=jnp.float32) + b_ref[...]     # (N*H,WCout)

    # ---- main branch (elementwise math kept f32 for v5e compatibility) ----
    h = _bgnorm(x2, scal_ref[0], scal_ref[1])
    h = _prelu(h, scal_ref[2])
    h = conv3x3(h, w1_ref, b1_ref)
    h = _bgnorm(h, scal_ref[3], scal_ref[4])
    h = _prelu(h, scal_ref[5])
    h = conv3x3(h, w2_ref, b2_ref)

    # ---- residual branch: grouped 1x1 conv as per-lane FMA taps (no densification) ----
    wrv = wr_ref[...]                             # (2*cg-1, W*Cout) per-lane tap weights
    cgm1 = (wrv.shape[0] - 1) // 2
    r = br_ref[...]                               # (1, W*Cout) bias
    for i in range(wrv.shape[0]):
        d = i - cgm1                              # in-group channel offset ci - co
        td = x2 if d == 0 else pltpu.roll(x2, shift=-d, axis=1)
        r = r + td * wrv[i:i + 1, :]
    r = _bgnorm(r, scal_ref[6], scal_ref[7])

    o_ref[...] = (h + r).astype(o_ref.dtype)      # lane-dense (N*H, W*Cout) store


def resblock_forward(x_nchw, params):
    N, Cin, H, W = x_nchw.shape
    Cout = params["w1"].shape[-1] // W
    # NCHW -> NHWC -> lane-packed (N, H, W*Cin); the reshape on contiguous NHWC is free.
    x = jnp.transpose(x_nchw, (0, 2, 3, 1)).reshape(N, H, W * Cin)

    # 8 scalar parameters (3 BGNorm gammas/betas + 2 PReLU slopes), kept in SMEM.
    scal = jnp.array([params["bn1_g"], params["bn1_b"], params["prelu1_a"],
                      params["bn2_g"], params["bn2_b"], params["prelu2_a"],
                      params["bn3_g"], params["bn3_b"]], dtype=jnp.float32)

    out = pl.pallas_call(
        resblock_kernel,
        out_shape=jax.ShapeDtypeStruct((N * H, W * Cout), jnp.float32),
        in_specs=[pl.BlockSpec(memory_space=pltpu.MemorySpace.SMEM)]
                 + [pl.BlockSpec(memory_space=pltpu.MemorySpace.VMEM)] * 7,
        out_specs=pl.BlockSpec(memory_space=pltpu.MemorySpace.VMEM),
        compiler_params=pltpu.CompilerParams(vmem_limit_bytes=32 * 1024 * 1024),
    )(scal, x, params["w1"], params["b1"], params["w2"], params["b2"],
      params["wr"], params["br"])

    return jnp.transpose(out.reshape(N, H, W, Cout), (0, 3, 1, 2))   # -> NCHW


def _conv3x3_toeplitz(w, width):
    # PyTorch Conv2d weight (Cout, Cin, 3, 3) -> single deep-K W-block-Toeplitz matrix
    # (3*W*Cin, W*Cout) in bf16; the 3 ky taps are stacked along K (matching the
    # kernel's lane-concat of the 3 row-shifted views) and reflect padding along W is
    # baked in.  Density is 3/W — fine while latency-bound; tile W with a halo if the
    # MXU (v5e first) ever becomes the binding unit.
    cout, cin = w.shape[0], w.shape[1]
    wn = np.asarray(w, np.float32)
    kdim = width * cin
    m = np.zeros((3 * kdim, width * cout), np.float32)
    for ky in range(3):
        for xo in range(width):
            for kx in range(3):
                xw = xo + kx - 1
                xi = 1 if xw < 0 else (width - 2 if xw >= width else xw)   # reflect
                m[ky * kdim + xi * cin: ky * kdim + (xi + 1) * cin,
                  xo * cout:(xo + 1) * cout] += wn[:, :, ky, kx].T
    return jnp.asarray(m, jnp.bfloat16)


def init_params(key, cin, cout, width):
    k1, k2, k3, k4, k5, k6 = jax.random.split(key, 6)
    groups = 16
    # PyTorch-layout weights.
    w1 = jax.random.normal(k1, (cout, cin, 3, 3), jnp.float32) * 0.1
    b1 = jax.random.normal(k2, (cout,), jnp.float32) * 0.01
    w2 = jax.random.normal(k3, (cout, cout, 3, 3), jnp.float32) * 0.1
    b2 = jax.random.normal(k4, (cout,), jnp.float32) * 0.01
    wr = jax.random.normal(k5, (cout, cin // groups, 1, 1), jnp.float32) * 0.1
    br = jax.random.normal(k6, (cout,), jnp.float32) * 0.01

    # Residual grouped 1x1 conv -> per-lane FMA tap weights over the packed layout.
    # TODO(synk): lane-packed residual path assumes Cin == Cout (as here); a Cin != Cout
    #             ResBlock would need a separate residual matmul path.
    assert cin == cout, "lane-packed residual path requires Cin == Cout"
    cg = cin // groups
    wr_np = np.asarray(wr, np.float32)[:, :, 0, 0]            # (Cout, cg)
    wr_lanes = np.zeros((2 * cg - 1, width * cout), np.float32)
    for lane in range(width * cout):
        co_full = lane % cout
        g, co = co_full // cg, co_full % cg
        for d in range(-(cg - 1), cg):
            ci = co + d
            if 0 <= ci < cg:
                wr_lanes[d + cg - 1, lane] = wr_np[g * cg + co, ci]

    def tile_bias(b):
        return jnp.tile(b, width).reshape(1, width * b.shape[0])

    return dict(
        w1=_conv3x3_toeplitz(w1, width), b1=tile_bias(b1),
        w2=_conv3x3_toeplitz(w2, width), b2=tile_bias(b2),
        wr=jnp.asarray(wr_lanes), br=tile_bias(br),
        # BatchNorm2d default init (weight=1, bias=0); PReLU default a=0.25
        bn1_g=1.0, bn1_b=0.0, prelu1_a=0.25,
        bn2_g=1.0, bn2_b=0.0, prelu2_a=0.25,
        bn3_g=1.0, bn3_b=0.0,
    )


if __name__ == "__main__":
    key = jax.random.PRNGKey(0)
    kx, kp = jax.random.split(key)
    # channels must be multiples of 16 (residual 1x1 conv uses groups=16); W*C = 256.
    N, Cin, Cout, H, W = 2, 16, 16, 16, 16
    x = jax.random.normal(kx, (N, Cin, H, W), jnp.float32)    # NCHW, like PyTorch
    params = init_params(kp, Cin, Cout, W)

    out = resblock_forward(x, params)
    jax.block_until_ready(out)
    assert out.shape == (N, Cout, H, W) and out.dtype == jnp.float32
    print("KERNEL_OK")
</pallas_src>

<mosaic_0001>
module attributes {stable_mosaic.version = 11 : i64} {
  func.func @resblock_kernel(%arg0: memref<8xf32, #tpu.memory_space<smem>>, %arg1: memref<2x16x256xf32, #tpu.memory_space<vmem>>, %arg2: memref<768x256xbf16, #tpu.memory_space<vmem>>, %arg3: memref<1x256xf32, #tpu.memory_space<vmem>>, %arg4: memref<768x256xbf16, #tpu.memory_space<vmem>>, %arg5: memref<1x256xf32, #tpu.memory_space<vmem>>, %arg6: memref<1x256xf32, #tpu.memory_space<vmem>>, %arg7: memref<1x256xf32, #tpu.memory_space<vmem>>, %arg8: memref<32x256xf32, #tpu.memory_space<vmem>>) attributes {dimension_semantics = [], scalar_prefetch = 0 : i64, scratch_operands = 0 : i64, tpu.core_type = #tpu.core_type<tc>} {
    %c0 = arith.constant 0 : index
    %c0_0 = arith.constant 0 : index
    %c0_1 = arith.constant 0 : index
    %0 = vector.load %arg1[%c0, %c0_0, %c0_1] : memref<2x16x256xf32, #tpu.memory_space<vmem>>, vector<2x16x256xf32>
    %1 = vector.shape_cast %0 : vector<2x16x256xf32> to vector<32x256xf32>
    %c0_2 = arith.constant 0 : index
    %2 = memref.load %arg0[%c0_2] : memref<8xf32, #tpu.memory_space<smem>>
    %c1 = arith.constant 1 : index
    %3 = memref.load %arg0[%c1] : memref<8xf32, #tpu.memory_space<smem>>
    %4 = vector.shape_cast %1 : vector<32x256xf32> to vector<1x32x256xf32>
    %cst = arith.constant dense<0.000000e+00> : vector<1xf32>
    %5 = vector.multi_reduction <add>, %4, %cst [1, 2] : vector<1x32x256xf32> to vector<1xf32>
    %6 = vector.shape_cast %5 : vector<1xf32> to vector<1x1x1xf32>
    %7 = vector.extract %6[0, 0, 0] : f32 from vector<1x1x1xf32>
    %8 = arith.mulf %1, %1 : vector<32x256xf32>
    %9 = vector.shape_cast %8 : vector<32x256xf32> to vector<1x32x256xf32>
    %cst_3 = arith.constant dense<0.000000e+00> : vector<1xf32>
    %10 = vector.multi_reduction <add>, %9, %cst_3 [1, 2] : vector<1x32x256xf32> to vector<1xf32>
    %11 = vector.shape_cast %10 : vector<1xf32> to vector<1x1x1xf32>
    %12 = vector.extract %11[0, 0, 0] : f32 from vector<1x1x1xf32>
    %cst_4 = arith.constant 8.192000e+03 : f32
    %13 = arith.divf %7, %cst_4 : f32
    %cst_5 = arith.constant 8.192000e+03 : f32
    %14 = arith.divf %12, %cst_5 : f32
    %15 = arith.mulf %13, %13 : f32
    %16 = arith.subf %14, %15 : f32
    %cst_6 = arith.constant 0.000000e+00 : f32
    %17 = arith.maximumf %16, %cst_6 : f32
    %cst_7 = arith.constant 9.99999974E-6 : f32
    %18 = arith.addf %17, %cst_7 : f32
    %19 = math.rsqrt %18 : f32
    %20 = arith.mulf %19, %2 : f32
    %21 = vector.broadcast %20 : f32 to vector<32x256xf32>
    %22 = arith.mulf %1, %21 : vector<32x256xf32>
    %23 = arith.mulf %13, %20 : f32
    %24 = arith.subf %3, %23 : f32
    %25 = vector.broadcast %24 : f32 to vector<32x256xf32>
    %26 = arith.addf %22, %25 : vector<32x256xf32>
    %c2 = arith.constant 2 : index
    %27 = memref.load %arg0[%c2] : memref<8xf32, #tpu.memory_space<smem>>
    %cst_8 = arith.constant 0.000000e+00 : f32
    %28 = vector.broadcast %cst_8 : f32 to vector<32x256xf32>
    %29 = arith.cmpf ogt, %26, %28 : vector<32x256xf32>
    %30 = vector.broadcast %27 : f32 to vector<32x256xf32>
    %31 = arith.mulf %30, %26 : vector<32x256xf32>
    %32 = arith.select %29, %26, %31 : vector<32x256xi1>, vector<32x256xf32>
    %33 = arith.truncf %32 : vector<32x256xf32> to vector<32x256xbf16>
    %34 = vector.shape_cast %33 : vector<32x256xbf16> to vector<2x16x256xbf16>
    %35 = vector.extract_strided_slice %34 {offsets = [0, 1, 0], sizes = [2, 1, 256], strides = [1, 1, 1]} : vector<2x16x256xbf16> to vector<2x1x256xbf16>
    %36 = vector.extract_strided_slice %34 {offsets = [0, 14, 0], sizes = [2, 1, 256], strides = [1, 1, 1]} : vector<2x16x256xbf16> to vector<2x1x256xbf16>
    %37 = tpu.concatenate %35, %34, %36 in 1 : vector<2x1x256xbf16>, vector<2x16x256xbf16>, vector<2x1x256xbf16> -> vector<2x18x256xbf16>
    %38 = vector.extract_strided_slice %37 {offsets = [0, 0, 0], sizes = [2, 16, 256], strides = [1, 1, 1]} : vector<2x18x256xbf16> to vector<2x16x256xbf16>
    %39 = vector.extract_strided_slice %37 {offsets = [0, 1, 0], sizes = [2, 16, 256], strides = [1, 1, 1]} : vector<2x18x256xbf16> to vector<2x16x256xbf16>
    %40 = vector.extract_strided_slice %37 {offsets = [0, 2, 0], sizes = [2, 16, 256], strides = [1, 1, 1]} : vector<2x18x256xbf16> to vector<2x16x256xbf16>
    %41 = tpu.concatenate %38, %39, %40 in 2 : vector<2x16x256xbf16>, vector<2x16x256xbf16>, vector<2x16x256xbf16> -> vector<2x16x768xbf16>
    %42 = vector.shape_cast %41 : vector<2x16x768xbf16> to vector<32x768xbf16>
    %c0_9 = arith.constant 0 : index
    %c0_10 = arith.constant 0 : index
    %43 = vector.load %arg2[%c0_9, %c0_10] : memref<768x256xbf16, #tpu.memory_space<vmem>>, vector<768x256xbf16>
    %cst_11 = arith.constant dense<0.000000e+00> : vector<32x256xf32>
    %44 = tpu.matmul %42, %43, %cst_11 {dimension_numbers = #tpu.dot_dimension_numbers<[1], [0], [0], [1], [0, 0, 1, 1], [], []>} : vector<32x768xbf16>, vector<768x256xbf16>, vector<32x256xf32> -> vector<32x256xf32>
    %c0_12 = arith.constant 0 : index
    %c0_13 = arith.constant 0 : index
    %45 = vector.load %arg3[%c0_12, %c0_13] : memref<1x256xf32, #tpu.memory_space<vmem>>, vector<1x256xf32>
    %46 = vector.broadcast %45 : vector<1x256xf32> to vector<32x256xf32>
    %47 = arith.addf %44, %46 : vector<32x256xf32>
    %c3 = arith.constant 3 : index
    %48 = memref.load %arg0[%c3] : memref<8xf32, #tpu.memory_space<smem>>
    %c4 = arith.constant 4 : index
    %49 = memref.load %arg0[%c4] : memref<8xf32, #tpu.memory_space<smem>>
    %50 = vector.shape_cast %47 : vector<32x256xf32> to vector<1x32x256xf32>
    %cst_14 = arith.constant dense<0.000000e+00> : vector<1xf32>
    %51 = vector.multi_reduction <add>, %50, %cst_14 [1, 2] : vector<1x32x256xf32> to vector<1xf32>
    %52 = vector.shape_cast %51 : vector<1xf32> to vector<1x1x1xf32>
    %53 = vector.extract %52[0, 0, 0] : f32 from vector<1x1x1xf32>
    %54 = arith.mulf %47, %47 : vector<32x256xf32>
    %55 = vector.shape_cast %54 : vector<32x256xf32> to vector<1x32x256xf32>
    %cst_15 = arith.constant dense<0.000000e+00> : vector<1xf32>
    %56 = vector.multi_reduction <add>, %55, %cst_15 [1, 2] : vector<1x32x256xf32> to vector<1xf32>
    %57 = vector.shape_cast %56 : vector<1xf32> to vector<1x1x1xf32>
    %58 = vector.extract %57[0, 0, 0] : f32 from vector<1x1x1xf32>
    %cst_16 = arith.constant 8.192000e+03 : f32
    %59 = arith.divf %53, %cst_16 : f32
    %cst_17 = arith.constant 8.192000e+03 : f32
    %60 = arith.divf %58, %cst_17 : f32
    %61 = arith.mulf %59, %59 : f32
    %62 = arith.subf %60, %61 : f32
    %cst_18 = arith.constant 0.000000e+00 : f32
    %63 = arith.maximumf %62, %cst_18 : f32
    %cst_19 = arith.constant 9.99999974E-6 : f32
    %64 = arith.addf %63, %cst_19 : f32
    %65 = math.rsqrt %64 : f32
    %66 = arith.mulf %65, %48 : f32
    %67 = vector.broadcast %66 : f32 to vector<32x256xf32>
    %68 = arith.mulf %47, %67 : vector<32x256xf32>
    %69 = arith.mulf %59, %66 : f32
    %70 = arith.subf %49, %69 : f32
    %71 = vector.broadcast %70 : f32 to vector<32x256xf32>
    %72 = arith.addf %68, %71 : vector<32x256xf32>
    %c5 = arith.constant 5 : index
    %73 = memref.load %arg0[%c5] : memref<8xf32, #tpu.memory_space<smem>>
    %cst_20 = arith.constant 0.000000e+00 : f32
    %74 = vector.broadcast %cst_20 : f32 to vector<32x256xf32>
    %75 = arith.cmpf ogt, %72, %74 : vector<32x256xf32>
    %76 = vector.broadcast %73 : f32 to vector<32x256xf32>
    %77 = arith.mulf %76, %72 : vector<32x256xf32>
    %78 = arith.select %75, %72, %77 : vector<32x256xi1>, vector<32x256xf32>
    %79 = arith.truncf %78 : vector<32x256xf32> to vector<32x256xbf16>
    %80 = vector.shape_cast %79 : vector<32x256xbf16> to vector<2x16x256xbf16>
    %81 = vector.extract_strided_slice %80 {offsets = [0, 1, 0], sizes = [2, 1, 256], strides = [1, 1, 1]} : vector<2x16x256xbf16> to vector<2x1x256xbf16>
    %82 = vector.extract_strided_slice %80 {offsets = [0, 14, 0], sizes = [2, 1, 256], strides = [1, 1, 1]} : vector<2x16x256xbf16> to vector<2x1x256xbf16>
    %83 = tpu.concatenate %81, %80, %82 in 1 : vector<2x1x256xbf16>, vector<2x16x256xbf16>, vector<2x1x256xbf16> -> vector<2x18x256xbf16>
    %84 = vector.extract_strided_slice %83 {offsets = [0, 0, 0], sizes = [2, 16, 256], strides = [1, 1, 1]} : vector<2x18x256xbf16> to vector<2x16x256xbf16>
    %85 = vector.extract_strided_slice %83 {offsets = [0, 1, 0], sizes = [2, 16, 256], strides = [1, 1, 1]} : vector<2x18x256xbf16> to vector<2x16x256xbf16>
    %86 = vector.extract_strided_slice %83 {offsets = [0, 2, 0], sizes = [2, 16, 256], strides = [1, 1, 1]} : vector<2x18x256xbf16> to vector<2x16x256xbf16>
    %87 = tpu.concatenate %84, %85, %86 in 2 : vector<2x16x256xbf16>, vector<2x16x256xbf16>, vector<2x16x256xbf16> -> vector<2x16x768xbf16>
    %88 = vector.shape_cast %87 : vector<2x16x768xbf16> to vector<32x768xbf16>
    %c0_21 = arith.constant 0 : index
    %c0_22 = arith.constant 0 : index
    %89 = vector.load %arg4[%c0_21, %c0_22] : memref<768x256xbf16, #tpu.memory_space<vmem>>, vector<768x256xbf16>
    %cst_23 = arith.constant dense<0.000000e+00> : vector<32x256xf32>
    %90 = tpu.matmul %88, %89, %cst_23 {dimension_numbers = #tpu.dot_dimension_numbers<[1], [0], [0], [1], [0, 0, 1, 1], [], []>} : vector<32x768xbf16>, vector<768x256xbf16>, vector<32x256xf32> -> vector<32x256xf32>
    %c0_24 = arith.constant 0 : index
    %c0_25 = arith.constant 0 : index
    %91 = vector.load %arg5[%c0_24, %c0_25] : memref<1x256xf32, #tpu.memory_space<vmem>>, vector<1x256xf32>
    %92 = vector.broadcast %91 : vector<1x256xf32> to vector<32x256xf32>
    %93 = arith.addf %90, %92 : vector<32x256xf32>
    %c0_26 = arith.constant 0 : index
    %c0_27 = arith.constant 0 : index
    %94 = vector.load %arg6[%c0_26, %c0_27] : memref<1x256xf32, #tpu.memory_space<vmem>>, vector<1x256xf32>
    %c0_28 = arith.constant 0 : index
    %c0_29 = arith.constant 0 : index
    %95 = vector.load %arg7[%c0_28, %c0_29] : memref<1x256xf32, #tpu.memory_space<vmem>>, vector<1x256xf32>
    %96 = vector.broadcast %94 : vector<1x256xf32> to vector<32x256xf32>
    %97 = arith.mulf %1, %96 : vector<32x256xf32>
    %98 = vector.broadcast %95 : vector<1x256xf32> to vector<32x256xf32>
    %99 = arith.addf %98, %97 : vector<32x256xf32>
    %c6 = arith.constant 6 : index
    %100 = memref.load %arg0[%c6] : memref<8xf32, #tpu.memory_space<smem>>
    %c7 = arith.constant 7 : index
    %101 = memref.load %arg0[%c7] : memref<8xf32, #tpu.memory_space<smem>>
    %102 = vector.shape_cast %99 : vector<32x256xf32> to vector<1x32x256xf32>
    %cst_30 = arith.constant dense<0.000000e+00> : vector<1xf32>
    %103 = vector.multi_reduction <add>, %102, %cst_30 [1, 2] : vector<1x32x256xf32> to vector<1xf32>
    %104 = vector.shape_cast %103 : vector<1xf32> to vector<1x1x1xf32>
    %105 = vector.extract %104[0, 0, 0] : f32 from vector<1x1x1xf32>
    %106 = arith.mulf %99, %99 : vector<32x256xf32>
    %107 = vector.shape_cast %106 : vector<32x256xf32> to vector<1x32x256xf32>
    %cst_31 = arith.constant dense<0.000000e+00> : vector<1xf32>
    %108 = vector.multi_reduction <add>, %107, %cst_31 [1, 2] : vector<1x32x256xf32> to vector<1xf32>
    %109 = vector.shape_cast %108 : vector<1xf32> to vector<1x1x1xf32>
    %110 = vector.extract %109[0, 0, 0] : f32 from vector<1x1x1xf32>
    %cst_32 = arith.constant 8.192000e+03 : f32
    %111 = arith.divf %105, %cst_32 : f32
    %cst_33 = arith.constant 8.192000e+03 : f32
    %112 = arith.divf %110, %cst_33 : f32
    %113 = arith.mulf %111, %111 : f32
    %114 = arith.subf %112, %113 : f32
    %cst_34 = arith.constant 0.000000e+00 : f32
    %115 = arith.maximumf %114, %cst_34 : f32
    %cst_35 = arith.constant 9.99999974E-6 : f32
    %116 = arith.addf %115, %cst_35 : f32
    %117 = math.rsqrt %116 : f32
    %118 = arith.mulf %117, %100 : f32
    %119 = vector.broadcast %118 : f32 to vector<32x256xf32>
    %120 = arith.mulf %99, %119 : vector<32x256xf32>
    %121 = arith.mulf %111, %118 : f32
    %122 = arith.subf %101, %121 : f32
    %123 = vector.broadcast %122 : f32 to vector<32x256xf32>
    %124 = arith.addf %120, %123 : vector<32x256xf32>
    %125 = arith.addf %93, %124 : vector<32x256xf32>
    %c0_36 = arith.constant 0 : index
    %c0_37 = arith.constant 0 : index
    %126 = vector.load %arg8[%c0_36, %c0_37] : memref<32x256xf32, #tpu.memory_space<vmem>>, vector<32x256xf32>
    tpu.vector_store %arg8[%c0_36, %c0_37], %125 {strides = array<i32>} : memref<32x256xf32, #tpu.memory_space<vmem>>, vector<32x256xf32>,
    return
  }
}

</mosaic_0001>

<bundles_post_ra>
// kernel: tpu_custom_call.1
= control target key start
LH: loop header
LB: loop body
LE: loop exit
PB: predicated region body
PF: predicated region fallthrough
CT: control target
= control target key end

     0   :  { %13 = vsyncpa [#allocation5], 0  ;;  %s3339_s0 = inlined_call_operand.hbm [shape: f32[8], index: 0, kind: input, shape index: {}]   ;;  %s3340_s1 = inlined_call_operand.hbm [shape: f32[2,16,256], index: 1, kind: input, shape index: {}]   ;;  %s3341_s2 = inlined_call_operand.hbm [shape: bf16[768,256], index: 2, kind: input, shape index: {}]   ;;  %s3342_s3 = inlined_call_operand.vmem [shape: f32[1,256], index: 3, kind: input, shape index: {}]   ;;  %s3343_s4 = inlined_call_operand.hbm [shape: bf16[768,256], index: 4, kind: input, shape index: {}]   ;;  %s3344_s5 = inlined_call_operand.vmem [shape: f32[1,256], index: 5, kind: input, shape index: {}]   ;;  %s3345_s6 = inlined_call_operand.vmem [shape: f32[1,256], index: 6, kind: input, shape index: {}]   ;;  %s3346_s7 = inlined_call_operand.vmem [shape: f32[1,256], index: 7, kind: input, shape index: {}]   ;;  %s3347_s8 = inlined_call_operand.hbm [shape: f32[32,256], index: 8, kind: output, shape index: {}]  }
   0x1   :  { %14 = vsyncpa [#allocation3], 0 }
   0x2   :  { %15 = vsyncpa [#allocation8], 0 }
   0x3   :  { %16 = vsyncpa [#allocation4], 0  ;;  %s2899_s27 = smov [#allocation7]   ;;  %s2793_s9 = scalar_lea.hbm %s3341_s2, 12288 }
   0x4   :  { %s42_s28 = sshll.u32 %s2899_s27, 4  ;;  %p2794_p0 = scmp.ne.s32.totalorder %s3341_s2, %s2793_s9  ;;  %s43_s28 = int_to_ptr.vmem [resolvable:$true] %s42_s28 }
   0x5   :  { %p2797_p1 = scmp.lt.u32.totalorder %s2793_s9, %s3341_s2 }
   0x7   :  { %p2799_p2 = pnand %p2797_p1, %p2794_p0 }
   0x9   :  { %2802 = shalt.err (!%p2799_p2)
}
   0xa   :  { %s2803_s14 = scalar_lea.vmem %s43_s28, 12288  ;;  %p2808_p4 = scmp.lt.s32.totalorder %s43_s28, %s43_s28 }
   0xb   :  { %p2804_p3 = scmp.ne.s32.totalorder %s43_s28, %s2803_s14  ;;  %p2809_p5 = scmp.lt.s32.totalorder %s2803_s14, %s2803_s14 }
   0xd   :  { %p2810_p6 = por %p2809_p5, %p2808_p4 }
   0xf   :  { %p2811_p7 = pnand %p2810_p6, %p2804_p3 }
  0x11   :  { %2814 = shalt.err (!%p2811_p7)
}
  0x12   :  { %s2900_s15 = smov 128   ;;  %s2901_s16 = smov 8  }
  0x13   :  { %48 = dma.hbm_to_vmem [thread:$0]  %s3341_s2, 12288, %s43_s28, [#allocation8], %s2900_s15, %s2900_s15, %s2901_s16  }
  0x14   :  { %s2815_s21 = scalar_lea.hbm %s3339_s0, 16 }
  0x15   :  { %p2816_p8 = scmp.ne.s32.totalorder %s3339_s0, %s2815_s21  ;;  %p2819_p9 = scmp.lt.u32.totalorder %s2815_s21, %s3339_s0 }
  0x17   :  { %p2821_p10 = pnand %p2819_p9, %p2816_p8 }
  0x19   :  { %2824 = shalt.err (!%p2821_p10)
}
  0x1a   :  { %s2902_s26 = smov [#allocation2]   ;;  %s2903_s2 = smov [#allocation6]  }
  0x1b   :  { %24 = dma.hbm_to_smem %s3339_s0, 16, %s2902_s26, [#allocation5]  }
  0x1c   :  { %s30_s28 = sshll.u32 %s2903_s2, 4  ;;  %s2825_s10 = scalar_lea.hbm %s3340_s1, 1024  ;;  %s31_s28 = int_to_ptr.vmem [resolvable:$true] %s30_s28 }
  0x1d   :  { %p2826_p11 = scmp.ne.s32.totalorder %s3340_s1, %s2825_s10  ;;  %p2829_p12 = scmp.lt.u32.totalorder %s2825_s10, %s3340_s1 }
  0x1f   :  { %p2831_p13 = pnand %p2829_p12, %p2826_p11 }
  0x21   :  { %2834 = shalt.err (!%p2831_p13)
}
  0x22   :  { %s2835_s17 = scalar_lea.vmem %s31_s28, 1024  ;;  %p2840_p1 = scmp.lt.s32.totalorder %s31_s28, %s31_s28 }
  0x23   :  { %p2836_p0 = scmp.ne.s32.totalorder %s31_s28, %s2835_s17  ;;  %p2841_p2 = scmp.lt.s32.totalorder %s2835_s17, %s2835_s17 }
  0x25   :  { %p2842_p3 = por %p2841_p2, %p2840_p1 }
  0x27   :  { %p2843_p4 = pnand %p2842_p3, %p2836_p0 }
  0x29   :  { %2846 = shalt.err (!%p2843_p4)
}
  0x2a   :  { %s2904_s0 = smov 256   ;;  %s2905_s18 = smov 16  }
  0x2b   :  { %36 = dma.hbm_to_vmem [thread:$0]  %s3340_s1, 1024, %s31_s28, [#allocation3], %s2904_s0, %s2904_s0, %s2905_s18  }
  0x2c   :  { %s2906_s21 = smov [#allocation9]   ;;  %s2847_s25 = scalar_lea.hbm %s3343_s4, 12288 }
  0x2d   :  { %s56_s22 = sshll.u32 %s2906_s21, 4  ;;  %p2848_p5 = scmp.ne.s32.totalorder %s3343_s4, %s2847_s25  ;;  %s57_s22 = int_to_ptr.vmem [resolvable:$true] %s56_s22 }
  0x2e   :  { %p2851_p6 = scmp.lt.u32.totalorder %s2847_s25, %s3343_s4 }
  0x30   :  { %p2853_p7 = pnand %p2851_p6, %p2848_p5 }
  0x32   :  { %2856 = shalt.err (!%p2853_p7)
}
  0x33   :  { %s2857_s30 = scalar_lea.vmem %s57_s22, 12288  ;;  %p2862_p9 = scmp.lt.s32.totalorder %s57_s22, %s57_s22 }
  0x34   :  { %p2858_p8 = scmp.ne.s32.totalorder %s57_s22, %s2857_s30  ;;  %p2863_p10 = scmp.lt.s32.totalorder %s2857_s30, %s2857_s30 }
  0x36   :  { %p2864_p11 = por %p2863_p10, %p2862_p9 }
  0x38   :  { %p2865_p12 = pnand %p2864_p11, %p2858_p8 }
  0x3a   :  { %2868 = shalt.err (!%p2865_p12)
}
  0x3b   :  { %62 = dma.hbm_to_vmem [thread:$0]  %s3343_s4, 12288, %s57_s22, [#allocation8], %s2900_s15, %s2900_s15, %s2901_s16  }
  0x3c   :  { %2891 = dma.done.wait [#allocation5], 16  }
  0x3d   :  { %2892 = vsyncadd [#allocation5], 4294967280 }
  0x3e   :  { %2893 = dma.done.wait [#allocation3], 1024  }
  0x3f   :  { %2894 = vsyncadd [#allocation3], 4294966272 }
  0x40   :  { %2895 = dma.done.wait [#allocation8], 24576  }
  0x41   :  { %2896 = vsyncadd [#allocation8], 4294942720 }
  0x42   :  { %81 = sfence }
  0x43   :  { %v3011_v0 = vld [vmem:[#allocation6] sm:$0xff]  ;;  %v3013_v1 = vld [vmem:[#allocation6 + $0x8] sm:$0xff]  ;;  %v3015_v2 = vld [vmem:[#allocation6 + $0x10] sm:$0xff]  ;;  %s2907_s12 = smov 0.0   ;;  %s90_s17 = sld [smem:[#allocation2]]  ;;  %vm244_vm0 = vcmask 1040384  }
  0x44   :  { %v92_v3 = vadd.f32 %v3013_v1, %v3011_v0  ;;  %v108_v4 = vmul.f32 %v3011_v0, %v3011_v0  ;;  %v109_v5 = vmul.f32 %v3013_v1, %v3013_v1  ;;  %v110_v6 = vmul.f32 %v3015_v2, %v3015_v2  ;;  %v3025_v7 = vld [vmem:[#allocation6 + $0x18] sm:$0xff]  ;;  %v3027_v8 = vld [vmem:[#allocation6 + $0x20] sm:$0xff]  ;;  %v3032_v12 = vld [vmem:[#allocation6 + $0x28] sm:$0xff]  ;;  %s2216_s19 = sld [smem:[#allocation2 + $0x1]]  ;;  %s2217_s20 = sld [smem:[#allocation2 + $0x2]] }
  0x45   :  { %v111_v10 = vmul.f32 %v3025_v7, %v3025_v7  ;;  %v112_v14 = vmul.f32 %v3027_v8, %v3027_v8  ;;  %v3037_v16 = vld [vmem:[#allocation6 + $0x30] sm:$0xff]  ;;  %v113_v18 = vmul.f32 %v3032_v12, %v3032_v12  ;;  %v3042_v20 = vld [vmem:[#allocation6 + $0x38] sm:$0xff]  ;;  %v2491_v30 = vld [vmem:[#allocation7 + $0x4] ss:$8 sps:$4 sm:$0xff]   ;;  %vm245_vm9 = vsmask.f32 256 }
  0x46   :  { %v93_v9 = vadd.f32 %v92_v3, %v3015_v2  ;;  %v116_v11 = vadd.f32 %v109_v5, %v108_v4  ;;  %v114_v22 = vmul.f32 %v3037_v16, %v3037_v16  ;;  %v115_v25 = vmul.f32 %v3042_v20, %v3042_v20  ;;  %v2493_v31 = vld [vmem:[#allocation7] ss:$8 sps:$4 sm:$0xff]   ;;  %v2494_v32 = vld [vmem:[#allocation7 + $0x14] ss:$8 sps:$4 sm:$0xff]   ;;  %921 = vmatprep.subr.bf16.mxu0 %v2491_v30  ;;  %v2496_v33 = vld [vmem:[#allocation7 + $0x10] ss:$8 sps:$4 sm:$0xff]  }
  0x47   :  { %922 = vmatpush1.bf16.msra.mxu0 %v2493_v31  ;;  %v2497_v34 = vld [vmem:[#allocation7 + $0x24] ss:$8 sps:$4 sm:$0xff]   ;;  %v2499_v35 = vld [vmem:[#allocation7 + $0x20] ss:$8 sps:$4 sm:$0xff]   ;;  %v2500_v36 = vld [vmem:[#allocation7 + $0x34] ss:$8 sps:$4 sm:$0xff]  }
  0x48   :  { %v94_v13 = vadd.f32 %v93_v9, %v3025_v7  ;;  %v117_v15 = vadd.f32 %v116_v11, %v110_v6  ;;  %923 = vmatprep.subr.bf16.mxu0 %v2494_v32  ;;  %v2502_v37 = vld [vmem:[#allocation7 + $0x30] ss:$8 sps:$4 sm:$0xff]   ;;  %v2503_v38 = vld [vmem:[#allocation7 + $0x44] ss:$8 sps:$4 sm:$0xff]   ;;  %v2505_v39 = vld [vmem:[#allocation7 + $0x40] ss:$8 sps:$4 sm:$0xff]  }
  0x49   :  { %v2506_v40 = vld [vmem:[#allocation7 + $0x54] ss:$8 sps:$4 sm:$0xff]   ;;  %v2508_v41 = vld [vmem:[#allocation7 + $0x50] ss:$8 sps:$4 sm:$0xff]   ;;  %v2509_v42 = vld [vmem:[#allocation7 + $0x64] ss:$8 sps:$4 sm:$0xff]  }
  0x4a   :  { %v95_v17 = vadd.f32 %v94_v13, %v3027_v8  ;;  %v118_v19 = vadd.f32 %v117_v15, %v111_v10  ;;  %v2511_v43 = vld [vmem:[#allocation7 + $0x60] ss:$8 sps:$4 sm:$0xff]   ;;  %v2512_v44 = vld [vmem:[#allocation7 + $0x74] ss:$8 sps:$4 sm:$0xff]   ;;  %v2514_v45 = vld [vmem:[#allocation7 + $0x70] ss:$8 sps:$4 sm:$0xff]  }
  0x4b   :  { %924 = vmatpush1.bf16.msra.mxu0 %v2496_v33  ;;  %v2515_v46 = vld [vmem:[#allocation7 + $0x84] ss:$8 sps:$4 sm:$0xff]   ;;  %v2517_v47 = vld [vmem:[#allocation7 + $0x80] ss:$8 sps:$4 sm:$0xff]   ;;  %v2518_v48 = vld [vmem:[#allocation7 + $0x94] ss:$8 sps:$4 sm:$0xff]  }
  0x4c   :  { %v96_v21 = vadd.f32 %v95_v17, %v3032_v12  ;;  %v119_v23 = vadd.f32 %v118_v19, %v112_v14  ;;  %925 = vmatprep.subr.bf16.mxu0 %v2497_v34  ;;  %v2520_v49 = vld [vmem:[#allocation7 + $0x90] ss:$8 sps:$4 sm:$0xff]   ;;  %v2521_v50 = vld [vmem:[#allocation7 + $0xa4] ss:$8 sps:$4 sm:$0xff]   ;;  %v2523_v51 = vld [vmem:[#allocation7 + $0xa0] ss:$8 sps:$4 sm:$0xff]  }
  0x4d   :  { %v2524_v60 = vld [vmem:[#allocation7 + $0xb4] ss:$8 sps:$4 sm:$0xff]   ;;  %v2526_v61 = vld [vmem:[#allocation7 + $0xb0] ss:$8 sps:$4 sm:$0xff]   ;;  %v2527_v5 = vld [vmem:[#allocation7 + $0xc4] ss:$8 sps:$4 sm:$0xff]  }
  0x4e   :  { %v97_v24 = vadd.f32 %v96_v21, %v3037_v16  ;;  %v120_v26 = vadd.f32 %v119_v23, %v113_v18  ;;  %v2529_v6 = vld [vmem:[#allocation7 + $0xc0] ss:$8 sps:$4 sm:$0xff]   ;;  %v2530_v10 = vld [vmem:[#allocation7 + $0xd4] ss:$8 sps:$4 sm:$0xff]   ;;  %v2532_v11 = vld [vmem:[#allocation7 + $0xd0] ss:$8 sps:$4 sm:$0xff]  }
  0x4f   :  { %926 = vmatpush1.bf16.msra.mxu0 %v2499_v35  ;;  %v2533_v14 = vld [vmem:[#allocation7 + $0xe4] ss:$8 sps:$4 sm:$0xff]   ;;  %v2535_v15 = vld [vmem:[#allocation7 + $0xe0] ss:$8 sps:$4 sm:$0xff]   ;;  %v2536_v17 = vld [vmem:[#allocation7 + $0xf4] ss:$8 sps:$4 sm:$0xff]  }
  0x50   :  { %v98_v27 = vadd.f32 %v97_v24, %v3042_v20  ;;  %v121_v28 = vadd.f32 %v120_v26, %v114_v22  ;;  %927 = vmatprep.subr.bf16.mxu0 %v2500_v36  ;;  %v2538_v18 = vld [vmem:[#allocation7 + $0xf0] ss:$8 sps:$4 sm:$0xff]   ;;  %v2541_v19 = vld [vmem:[#allocation7 + $0x104] ss:$8 sps:$4 sm:$0xff]   ;;  %vm3061_vm10 = vmand %vm244_vm0, %vm245_vm9  ;;  %vm255_vm11 = vsmask.f32 7424 }
  0x51   :  { %vm316_vm12 = vcmask 1046528   ;;  %s2414_s29 = sld [smem:[#allocation2 + $0x7]] }
  0x52   :  { %99 = vadd.xlane.f32.xlu0 %v98_v27  ;;  %v122_v29 = vadd.f32 %v121_v28, %v115_v25  ;;  %v175_v25 = vstv %s2217_s20 }
  0x53   :  { %928 = vmatpush1.bf16.msra.mxu0 %v2502_v37 }
  0x54   :  { %929 = vmatprep.subr.bf16.mxu0 %v2503_v38 }
  0x56   :  { %123 = vadd.xlane.f32.xlu0 %v122_v29 }
  0x57   :  { %930 = vmatpush1.bf16.msra.mxu0 %v2505_v39 }
  0x58   :  { %931 = vmatprep.subr.bf16.mxu0 %v2506_v40 }
  0x5b   :  { %932 = vmatpush1.bf16.msra.mxu0 %v2508_v41 }
  0x5c   :  { %933 = vmatprep.subr.bf16.mxu0 %v2509_v42 }
  0x5f   :  { %934 = vmatpush1.bf16.msra.mxu0 %v2511_v43 }
  0x60   :  { %935 = vmatprep.subr.bf16.mxu0 %v2512_v44 }
  0x63   :  { %936 = vmatpush1.bf16.msra.mxu0 %v2514_v45 }
  0x64   :  { %937 = vmatprep.subr.bf16.mxu0 %v2515_v46 }
  0x67   :  { %938 = vmatpush1.bf16.msra.mxu0 %v2517_v47 }
  0x68   :  { %939 = vmatprep.subr.bf16.mxu0 %v2518_v48 }
  0x6b   :  { %940 = vmatpush1.bf16.msra.mxu0 %v2520_v49 }
  0x6c   :  { %941 = vmatprep.subr.bf16.mxu0 %v2521_v50 }
  0x6f   :  { %942 = vmatpush1.bf16.msra.mxu0 %v2523_v51 }
  0x70   :  { %943 = vmatprep.subr.bf16.mxu0 %v2524_v60 }
  0x73   :  { %944 = vmatpush1.bf16.msra.mxu0 %v2526_v61 }
  0x74   :  { %945 = vmatprep.subr.bf16.mxu0 %v2527_v5 }
  0x77   :  { %946 = vmatpush1.bf16.msra.mxu0 %v2529_v6 }
  0x78   :  { %947 = vmatprep.subr.bf16.mxu0 %v2530_v10  ;;  %v2544_v10 = vld [vmem:[#allocation7 + $0x114] ss:$8 sps:$4 sm:$0xff]  }
  0x7b   :  { %948 = vmatpush1.bf16.msra.mxu0 %v2532_v11 }
  0x7c   :  { %949 = vmatprep.subr.bf16.mxu0 %v2533_v14 }
  0x7f   :  { %950 = vmatpush1.bf16.msra.mxu0 %v2535_v15 }
  0x80   :  { %951 = vmatprep.subr.bf16.mxu0 %v2536_v17 }
  0x83   :  { %952 = vmatpush1.bf16.msra.mxu0 %v2538_v18 }
  0x84   :  { %974 = vmatprep.subr.bf16.mxu0 %v2541_v19 }
  0xdf   :  { %v100_v52 = vpop.xlane.xlu0 %99 }
  0xe0   :  { %v101_v53 = vrot.slane %v100_v52, 4 }
  0xe2   :  { %v102_v54 = vadd.f32 %v101_v53, %v100_v52 }
  0xe3   :  { %v124_v55 = vpop.xlane.xlu0 %123 }
  0xe4   :  { %v103_v56 = vrot.slane %v102_v54, 2  ;;  %v125_v57 = vrot.slane %v124_v55, 4 }
  0xe6   :  { %v126_v58 = vadd.f32 %v125_v57, %v124_v55  ;;  %v104_v59 = vadd.f32 %v103_v56, %v102_v54 }
  0xe8   :  { %v127_v62 = vrot.slane %v126_v58, 2  ;;  %v105_v63 = vrot.slane %v104_v59, 1 }
  0xea   :  { %v106_v3 = vadd.f32 %v105_v63, %v104_v59  ;;  %v128_v4 = vadd.f32 %v127_v62, %v126_v58 }
  0xec   :  { %2463 = vpush %v106_v3  ;;  %v129_v9 = vrot.slane %v128_v4, 1  ;;  %v2539_v3 = vld [vmem:[#allocation7 + $0x100] ss:$8 sps:$4 sm:$0xff]  }
  0xee   :  { %v130_v13 = vadd.f32 %v129_v9, %v128_v4 }
  0xf0   :  { %2465 = vpush %v130_v13 }
 0x11d   :  { %s2464_s4 = spop %2463 }
 0x11e   :  { %s134_s15 = smul.f32 0.00012207031, %s2464_s4 }
 0x120   :  { %s138_s16 = smul.f32 %s134_s15, %s134_s15 }
 0x121   :  { %s2466_s9 = spop %2465 }
 0x122   :  { %s137_s10 = smul.f32 0.00012207031, %s2466_s9  ;;  %s2314_s9 = sld [smem:[#allocation2 + $0x3]] }
 0x124   :  { %s139_s11 = ssub.f32 %s137_s10, %s138_s16  ;;  %s2315_s10 = sld [smem:[#allocation2 + $0x4]] }
 0x126   :  { %s140_s13 = smax.f32 %s2907_s12, %s139_s11  ;;  %s2316_s11 = sld [smem:[#allocation2 + $0x5]] }
 0x127   :  { %s141_s14 = sadd.f32 1e-05, %s140_s13 }
 0x129   :  { %v142_v21 = vstv %s141_s14 }
 0x12a   :  { %2779 = vrsqrt.f32 %v142_v21 }
 0x134   :  { %v2780_v22 = vpop.eup %2779 }
 0x135   :  { %2467 = vpush %v2780_v22 }
 0x166   :  { %s2468_s21 = spop %2467 }
 0x167   :  { %s145_s22 = smul.f32 %s2468_s21, %s90_s17 }
 0x169   :  { %v146_v23 = vstv %s145_s22  ;;  %s155_s23 = smul.f32 %s145_s22, %s134_s15 }
 0x16a   :  { %v148_v24 = vmul.f32 %v146_v23, %v3013_v1  ;;  %v150_v26 = vmul.f32 %v146_v23, %v3025_v7  ;;  %v147_v27 = vmul.f32 %v146_v23, %v3011_v0  ;;  %v149_v28 = vmul.f32 %v146_v23, %v3015_v2 }
 0x16b   :  { %s156_s24 = ssub.f32 %s2216_s19, %s155_s23  ;;  %v152_v29 = vmul.f32 %v146_v23, %v3032_v12  ;;  %v154_v31 = vmul.f32 %v146_v23, %v3042_v20  ;;  %v151_v32 = vmul.f32 %v146_v23, %v3027_v8  ;;  %v153_v33 = vmul.f32 %v146_v23, %v3037_v16  ;;  %v2542_v23 = vld [vmem:[#allocation7 + $0x110] ss:$8 sps:$4 sm:$0xff]  }
 0x16d   :  { %v157_v30 = vstv %s156_s24 }
 0x16e   :  { %v159_v34 = vadd.f32 %v157_v30, %v148_v24  ;;  %v161_v35 = vadd.f32 %v157_v30, %v150_v26  ;;  %v158_v1 = vadd.f32 %v157_v30, %v147_v27  ;;  %v160_v36 = vadd.f32 %v157_v30, %v149_v28  ;;  %v2547_v27 = vld [vmem:[#allocation7 + $0x124] ss:$8 sps:$4 sm:$0xff]  }
 0x16f   :  { %v163_v37 = vadd.f32 %v157_v30, %v152_v29  ;;  %v165_v7 = vadd.f32 %v157_v30, %v154_v31  ;;  %v162_v38 = vadd.f32 %v157_v30, %v151_v32  ;;  %v164_v0 = vadd.f32 %v157_v30, %v153_v33  ;;  %v2545_v32 = vld [vmem:[#allocation7 + $0x120] ss:$8 sps:$4 sm:$0xff]  }
 0x170   :  { %vm168_vm1 = vcmp.gt.f32.partialorder %v159_v34, 0.0  ;;  %vm170_vm2 = vcmp.gt.f32.partialorder %v161_v35, 0.0  ;;  %v177_v2 = vmul.f32 %v175_v25, %v159_v34  ;;  %v179_v12 = vmul.f32 %v175_v25, %v161_v35 }
 0x171   :  { %vm167_vm3 = vcmp.gt.f32.partialorder %v158_v1, 0.0  ;;  %vm169_vm4 = vcmp.gt.f32.partialorder %v160_v36, 0.0  ;;  %v176_v20 = vmul.f32 %v175_v25, %v158_v1  ;;  %v178_v39 = vmul.f32 %v175_v25, %v160_v36 }
 0x172   :  { %v185_v8 = vsel %vm168_vm1, %v159_v34, %v177_v2  ;;  %v187_v40 = vsel %vm170_vm2, %v161_v35, %v179_v12  ;;  %vm172_vm5 = vcmp.gt.f32.partialorder %v163_v37, 0.0  ;;  %vm174_vm6 = vcmp.gt.f32.partialorder %v165_v7, 0.0 }
 0x173   :  { %v193_v16 = vpack.c.bf16 %v187_v40, %v185_v8  ;;  %v184_v41 = vsel %vm167_vm3, %v158_v1, %v176_v20  ;;  %v186_v42 = vsel %vm169_vm4, %v160_v36, %v178_v39  ;;  %v181_v43 = vmul.f32 %v175_v25, %v163_v37  ;;  %v2548_v8 = vld [vmem:[#allocation7 + $0x130] ss:$8 sps:$4 sm:$0xff]  }
 0x174   :  { %v192_v44 = vpack.c.bf16 %v186_v42, %v184_v41  ;;  %v183_v45 = vmul.f32 %v175_v25, %v165_v7  ;;  %vm171_vm7 = vcmp.gt.f32.partialorder %v162_v38, 0.0  ;;  %vm173_vm8 = vcmp.gt.f32.partialorder %v164_v0, 0.0  ;;  %v2553_v41 = vld [vmem:[#allocation7 + $0x144] ss:$8 sps:$4 sm:$0xff]  }
 0x175   :  { %v200_v46 = vshrl.u32 %v193_v16, 16  ;;  %v217_v47 = vshll.u32 %v193_v16, 16  ;;  %v189_v48 = vsel %vm172_vm5, %v163_v37, %v181_v43  ;;  %v180_v49 = vmul.f32 %v175_v25, %v162_v38 }
 0x176   :  { %v197_v50 = vshrl.u32 %v192_v44, 16  ;;  %v191_v51 = vsel %vm174_vm6, %v165_v7, %v183_v45  ;;  %v182_v52 = vmul.f32 %v175_v25, %v164_v0  ;;  %v213_v58 = vshll.u32 %v192_v44, 16  ;;  %v2550_v7 = vld [vmem:[#allocation7 + $0x134] ss:$8 sps:$4 sm:$0xff]  }
 0x177   :  { %v216_v53 = vrot.slane %v200_v46, 7  ;;  %v195_v54 = vpack.c.bf16 %v191_v51, %v189_v48  ;;  %v188_v55 = vsel %vm171_vm7, %v162_v38, %v180_v49  ;;  %v237_v56 = vrot.slane %v217_v47, 7  ;;  %v2554_v48 = vld [vmem:[#allocation7 + $0x150] ss:$8 sps:$4 sm:$0xff]   ;;  %v2559_v49 = vld [vmem:[#allocation7 + $0x164] ss:$8 sps:$4 sm:$0xff]  }
 0x178   :  { %v212_v57 = vrot.slane %v197_v50, 7  ;;  %v190_v59 = vsel %vm173_vm8, %v164_v0, %v182_v52  ;;  %v236_v21 = vrot.slane %v213_v58, 7  ;;  %v2562_v51 = vld [vmem:[#allocation7 + $0x174] ss:$8 sps:$4 sm:$0xff]   ;;  %v2560_v52 = vld [vmem:[#allocation7 + $0x170] ss:$8 sps:$4 sm:$0xff]  }
 0x179   :  { %v219_v60 = vor.u32 %v217_v47, %v216_v53  ;;  %v206_v62 = vshrl.u32 %v195_v54, 16  ;;  %v194_v63 = vpack.c.bf16 %v190_v59, %v188_v55  ;;  %v225_v5 = vshll.u32 %v195_v54, 16  ;;  %v2556_v47 = vld [vmem:[#allocation7 + $0x154] ss:$8 sps:$4 sm:$0xff]   ;;  %v2563_v54 = vld [vmem:[#allocation7 + $0x180] ss:$8 sps:$4 sm:$0xff]  }
 0x17a   :  { %v215_v4 = vor.u32 %v213_v58, %v212_v57  ;;  %v252_v17 = vsel %vm3061_vm10, %v216_v53, %v237_v56  ;;  %v3081_v33 = vsel %vm3061_vm10, %v212_v57, %v236_v21  ;;  %v2565_v53 = vld [vmem:[#allocation7 + $0x184] ss:$8 sps:$4 sm:$0xff]   ;;  %v2568_v55 = vld [vmem:[#allocation7 + $0x194] ss:$8 sps:$4 sm:$0xff]   ;;  %v2566_v56 = vld [vmem:[#allocation7 + $0x190] ss:$8 sps:$4 sm:$0xff]  }
 0x17b   :  { %v248_v6 = vsel %vm3061_vm10, %v200_v46, %v219_v60  ;;  %v224_v9 = vrot.slane %v206_v62, 7  ;;  %v203_v11 = vshrl.u32 %v194_v63, 16  ;;  %v221_v15 = vshll.u32 %v194_v63, 16  ;;  %v2551_v46 = vld [vmem:[#allocation7 + $0x140] ss:$8 sps:$4 sm:$0xff]  }
 0x17c   :  { %v271_v13 = vshll.u32 %v248_v6, 16  ;;  %953 = vmatprep.mubr.bf16.mxu0 %v248_v6  ;;  %v3069_v14 = vsel %vm3061_vm10, %v197_v50, %v215_v4  ;;  %v239_v22 = vrot.slane %v225_v5, 7  ;;  %v269_v25 = vshrl.u32 %v248_v6, 16  ;;  %v2557_v50 = vld [vmem:[#allocation7 + $0x160] ss:$8 sps:$4 sm:$0xff]  }
 0x17d   :  { %954 = vmatmul.mubr.bf16.vlgmr.msra.gmra.mrb[0].mxu0 %v3069_v14  ;;  %v227_v18 = vor.u32 %v225_v5, %v224_v9  ;;  %v220_v24 = vrot.slane %v203_v11, 7  ;;  %v276_v28 = vshll.u32 %v252_v17, 16  ;;  %v238_v30 = vrot.slane %v221_v15, 7  ;;  %v2571_v57 = vld [vmem:[#allocation7 + $0x1a4] ss:$8 sps:$4 sm:$0xff]  }
 0x17e   :  { %v273_v19 = vrot.slane %v271_v13, 1  ;;  %975 = vmatpush1.bf16.msra.mxu0 %v2539_v3  ;;  %v3085_v34 = vsel %vm3061_vm10, %v224_v9, %v239_v22  ;;  %v320_v35 = vrot.slane %v248_v6, 1  ;;  %v317_v1 = vrot.slane %v3069_v14, 1  ;;  %v2569_v58 = vld [vmem:[#allocation7 + $0x1a0] ss:$8 sps:$4 sm:$0xff]  }
 0x17f   :  { %v3076_v26 = vsel %vm3061_vm10, %v206_v62, %v227_v18  ;;  %976 = vmatprep.subr.bf16.mxu0 %v2544_v10  ;;  %v223_v29 = vor.u32 %v221_v15, %v220_v24  ;;  %v278_v37 = vrot.slane %v276_v28, 1  ;;  %v3094_v38 = vsel %vm3061_vm10, %v220_v24, %v238_v30  ;;  %v2574_v59 = vld [vmem:[#allocation7 + $0x1b4] ss:$8 sps:$4 sm:$0xff]   ;;  %v2572_v60 = vld [vmem:[#allocation7 + $0x1b0] ss:$8 sps:$4 sm:$0xff]  }
 0x180   :  { %963 = vmatprep.mubr.bf16.mxu0 %v3076_v26  ;;  %v274_v31 = vor.u32 %v273_v19, %v269_v25  ;;  %v321_v0 = vrot.slane %v252_v17, 1  ;;  %v318_v12 = vrot.slane %v3081_v33, 1  ;;  %v326_v20 = vrot.slane %v3076_v26, 1  ;;  %v2577_v62 = vld [vmem:[#allocation7 + $0x1c4] ss:$8 sps:$4 sm:$0xff]  }
 0x181   :  { %v3090_v36 = vsel %vm3061_vm10, %v203_v11, %v223_v29  ;;  %v327_v39 = vrot.slane %v3085_v34, 1  ;;  %v324_v44 = vrot.slane %v3094_v38, 1  ;;  %v2575_v63 = vld [vmem:[#allocation7 + $0x1c0] ss:$8 sps:$4 sm:$0xff]   ;;  %v2580_v3 = vld [vmem:[#allocation7 + $0x1d4] ss:$8 sps:$4 sm:$0xff]  }
 0x182   :  { %977 = vmatpush1.bf16.msra.mxu0 %v2542_v23  ;;  %v279_v2 = vsel %vm255_vm11, %v274_v31, %v278_v37  ;;  %v3102_v40 = vsel %vm316_vm12, %v320_v35, %v321_v0  ;;  %v323_v16 = vrot.slane %v3090_v36, 1  ;;  %v3106_v42 = vsel %vm316_vm12, %v317_v1, %v318_v12  ;;  %v2578_v4 = vld [vmem:[#allocation7 + $0x1d0] ss:$8 sps:$4 sm:$0xff]   ;;  %v2583_v5 = vld [vmem:[#allocation7 + $0x1e4] ss:$8 sps:$4 sm:$0xff]  }
 0x183   :  { %978 = vmatprep.subr.bf16.mxu0 %v2547_v27  ;;  %v3109_v43 = vsel %vm316_vm12, %v326_v20, %v327_v39  ;;  %v259_v6 = vshll.u32 %v3069_v14, 16  ;;  %v295_v9 = vshll.u32 %v3076_v26, 16  ;;  %v2581_v10 = vld [vmem:[#allocation7 + $0x1e0] ss:$8 sps:$4 sm:$0xff]   ;;  %v2586_v11 = vld [vmem:[#allocation7 + $0x1f4] ss:$8 sps:$4 sm:$0xff]  }
 0x184   :  { %v3113_v45 = vsel %vm316_vm12, %v323_v16, %v324_v44  ;;  %v257_v17 = vshrl.u32 %v3069_v14, 16  ;;  %v2584_v18 = vld [vmem:[#allocation7 + $0x1f0] ss:$8 sps:$4 sm:$0xff]   ;;  %v264_v19 = vshll.u32 %v3081_v33, 16  ;;  %v293_v21 = vshrl.u32 %v3076_v26, 16 }
 0x185   :  { %964 = vmatmul.mubr.bf16.gmra.mrb[4].mxu0 %v3090_v36  ;;  %v261_v13 = vrot.slane %v259_v6, 1  ;;  %v297_v15 = vrot.slane %v295_v9, 1  ;;  %v2589_v22 = vld [vmem:[#allocation7 + $0x204] ss:$8 sps:$4 sm:$0xff]   ;;  %v300_v23 = vshll.u32 %v3085_v34, 16  ;;  %v283_v25 = vshll.u32 %v3090_v36, 16 }
 0x186   :  { %979 = vmatpush1.bf16.msra.mxu0 %v2545_v32  ;;  %1006 = vmatprep.mubr.bf16.mxu0 %v279_v2  ;;  %v266_v28 = vrot.slane %v264_v19, 1  ;;  %v2587_v29 = vld [vmem:[#allocation7 + $0x200] ss:$8 sps:$4 sm:$0xff]   ;;  %v2592_v14 = vld [vmem:[#allocation7 + $0x214] ss:$8 sps:$4 sm:$0xff]   ;;  %v281_v33 = vshrl.u32 %v3090_v36, 16 }
 0x187   :  { %980 = vmatprep.subr.bf16.mxu0 %v2550_v7  ;;  %v262_v24 = vor.u32 %v261_v13, %v257_v17  ;;  %v298_v27 = vor.u32 %v297_v15, %v293_v21  ;;  %v302_v30 = vrot.slane %v300_v23, 1  ;;  %v285_v31 = vrot.slane %v283_v25, 1  ;;  %v2590_v34 = vld [vmem:[#allocation7 + $0x210] ss:$8 sps:$4 sm:$0xff]   ;;  %v2595_v1 = vld [vmem:[#allocation7 + $0x224] ss:$8 sps:$4 sm:$0xff]  }
 0x188   :  { %v288_v35 = vshll.u32 %v3094_v38, 16  ;;  %v2593_v0 = vld [vmem:[#allocation7 + $0x220] ss:$8 sps:$4 sm:$0xff]   ;;  %v2598_v2 = vld [vmem:[#allocation7 + $0x234] ss:$8 sps:$4 sm:$0xff]  }
 0x189   :  { %v267_v32 = vsel %vm255_vm11, %v262_v24, %v266_v28  ;;  %v303_v26 = vsel %vm255_vm11, %v298_v27, %v302_v30  ;;  %v286_v37 = vor.u32 %v285_v31, %v281_v33  ;;  %v2596_v36 = vld [vmem:[#allocation7 + $0x230] ss:$8 sps:$4 sm:$0xff]   ;;  %v2601_v20 = vld [vmem:[#allocation7 + $0x244] ss:$8 sps:$4 sm:$0xff]   ;;  %v2599_v39 = vld [vmem:[#allocation7 + $0x240] ss:$8 sps:$4 sm:$0xff]  }
 0x18a   :  { %981 = vmatpush1.bf16.msra.mxu0 %v2548_v8  ;;  %v290_v7 = vrot.slane %v288_v35, 1  ;;  %v2604_v38 = vld [vmem:[#allocation7 + $0x254] ss:$8 sps:$4 sm:$0xff]   ;;  %v2602_v8 = vld [vmem:[#allocation7 + $0x250] ss:$8 sps:$4 sm:$0xff]  }
 0x18b   :  { %982 = vmatprep.subr.bf16.mxu0 %v2553_v41  ;;  %v2607_v16 = vld [vmem:[#allocation7 + $0x264] ss:$8 sps:$4 sm:$0xff]   ;;  %v2605_v41 = vld [vmem:[#allocation7 + $0x260] ss:$8 sps:$4 sm:$0xff]   ;;  %v2610_v44 = vld [vmem:[#allocation7 + $0x274] ss:$8 sps:$4 sm:$0xff]  }
 0x18c   :  { %v291_v12 = vsel %vm255_vm11, %v286_v37, %v290_v7 }
 0x18e   :  { %983 = vmatpush1.bf16.msra.mxu0 %v2551_v46  ;;  %v2608_v46 = vld [vmem:[#allocation7 + $0x270] ss:$8 sps:$4 sm:$0xff]  }
 0x18f   :  { %984 = vmatprep.subr.bf16.mxu0 %v2556_v47  ;;  %v2613_v47 = vld [vmem:[#allocation7 + $0x284] ss:$8 sps:$4 sm:$0xff]  }
 0x192   :  { %985 = vmatpush1.bf16.msra.mxu0 %v2554_v48  ;;  %v2616_v48 = vld [vmem:[#allocation7 + $0x294] ss:$8 sps:$4 sm:$0xff]  }
 0x193   :  { %986 = vmatprep.subr.bf16.mxu0 %v2559_v49  ;;  %v2614_v49 = vld [vmem:[#allocation7 + $0x290] ss:$8 sps:$4 sm:$0xff]  }
 0x196   :  { %987 = vmatpush1.bf16.msra.mxu0 %v2557_v50  ;;  %v2619_v50 = vld [vmem:[#allocation7 + $0x2a4] ss:$8 sps:$4 sm:$0xff]  }
 0x197   :  { %988 = vmatprep.subr.bf16.mxu0 %v2562_v51  ;;  %v2617_v51 = vld [vmem:[#allocation7 + $0x2a0] ss:$8 sps:$4 sm:$0xff]  }
 0x19a   :  { %989 = vmatpush1.bf16.msra.mxu0 %v2560_v52  ;;  %v2622_v52 = vld [vmem:[#allocation7 + $0x2b4] ss:$8 sps:$4 sm:$0xff]  }
 0x19b   :  { %990 = vmatprep.subr.bf16.mxu0 %v2565_v53  ;;  %v2620_v53 = vld [vmem:[#allocation7 + $0x2b0] ss:$8 sps:$4 sm:$0xff]  }
 0x19e   :  { %991 = vmatpush1.bf16.msra.mxu0 %v2563_v54  ;;  %v2625_v54 = vld [vmem:[#allocation7 + $0x2c4] ss:$8 sps:$4 sm:$0xff]  }
 0x19f   :  { %992 = vmatprep.subr.bf16.mxu0 %v2568_v55  ;;  %v2623_v55 = vld [vmem:[#allocation7 + $0x2c0] ss:$8 sps:$4 sm:$0xff]  }
 0x1a2   :  { %993 = vmatpush1.bf16.msra.mxu0 %v2566_v56  ;;  %v2628_v56 = vld [vmem:[#allocation7 + $0x2d4] ss:$8 sps:$4 sm:$0xff]  }
 0x1a3   :  { %994 = vmatprep.subr.bf16.mxu0 %v2571_v57  ;;  %v2626_v57 = vld [vmem:[#allocation7 + $0x2d0] ss:$8 sps:$4 sm:$0xff]  }
 0x1a6   :  { %995 = vmatpush1.bf16.msra.mxu0 %v2569_v58  ;;  %v2631_v58 = vld [vmem:[#allocation7 + $0x2e4] ss:$8 sps:$4 sm:$0xff]  }
 0x1a7   :  { %996 = vmatprep.subr.bf16.mxu0 %v2574_v59  ;;  %v2629_v59 = vld [vmem:[#allocation7 + $0x2e0] ss:$8 sps:$4 sm:$0xff]  }
 0x1aa   :  { %997 = vmatpush1.bf16.msra.mxu0 %v2572_v60  ;;  %v2634_v60 = vld [vmem:[#allocation7 + $0x2f4] ss:$8 sps:$4 sm:$0xff]  }
 0x1ab   :  { %998 = vmatprep.subr.bf16.mxu0 %v2577_v62  ;;  %v2632_v62 = vld [vmem:[#allocation7 + $0x2f0] ss:$8 sps:$4 sm:$0xff]  }
 0x1ae   :  { %999 = vmatpush1.bf16.msra.mxu0 %v2575_v63  ;;  %v431_v63 = vlaneseq }
 0x1af   :  { %1000 = vmatprep.subr.bf16.mxu0 %v2580_v3 }
 0x1b0   :  { %v432_v3 = vshrl.u32 %v431_v63, 7  ;;  %v2662_v63 = vld [vmem:[#allocation9 + $0x94] ss:$8 sps:$4 sm:$0xff]  }
 0x1b2   :  { %1001 = vmatpush1.bf16.msra.mxu0 %v2578_v4  ;;  %v3131_v4 = vsub.s32 0, %v432_v3  ;;  %v3136_v6 = vsub.s32 1, %v432_v3  ;;  %v2664_v3 = vld [vmem:[#allocation9 + $0x90] ss:$8 sps:$4 sm:$0xff]  }
 0x1b3   :  { %1002 = vmatprep.subr.bf16.mxu0 %v2583_v5  ;;  %v429_v5 = vld [vmem:[%s3342_s3] sm:$0x3] }
 0x1b4   :  { %v434_v9 = vrot.slane %v429_v5, %v3131_v4 }
 0x1b6   :  { %1003 = vmatpush1.bf16.msra.mxu0 %v2581_v10  ;;  %v438_v10 = vrot.slane %v429_v5, %v3136_v6  ;;  %v2665_v5 = vld [vmem:[#allocation9 + $0xa4] ss:$8 sps:$4 sm:$0xff]  }
 0x1b7   :  { %1004 = vmatprep.subr.bf16.mxu0 %v2586_v11 }
 0x1ba   :  { %1005 = vmatpush1.bf16.msra.mxu0 %v2584_v18 }
 0x1bb   :  { %1027 = vmatprep.subr.bf16.mxu0 %v2589_v22 }
 0x1bd   :  { %1007 = vmatmul.mubr.bf16.vlgmr.msra.gmra.mrb[0].mxu0 %v267_v32 }
 0x1be   :  { %1016 = vmatprep.mubr.bf16.mxu0 %v303_v26  ;;  %1028 = vmatpush1.bf16.msra.mxu0 %v2587_v29 }
 0x1bf   :  { %1029 = vmatprep.subr.bf16.mxu0 %v2592_v14 }
 0x1c2   :  { %1030 = vmatpush1.bf16.msra.mxu0 %v2590_v34 }
 0x1c3   :  { %1031 = vmatprep.subr.bf16.mxu0 %v2595_v1 }
 0x1c5   :  { %1017 = vmatmul.mubr.bf16.gmra.mrb[4].mxu0 %v291_v12 }
 0x1c6   :  { %1032 = vmatpush1.bf16.msra.mxu0 %v2593_v0  ;;  %1059 = vmatprep.mubr.bf16.mxu0 %v3102_v40  ;;  %v2611_v40 = vld [vmem:[#allocation7 + $0x280] ss:$8 sps:$4 sm:$0xff]  }
 0x1c7   :  { %1033 = vmatprep.subr.bf16.mxu0 %v2598_v2 }
 0x1ca   :  { %1034 = vmatpush1.bf16.msra.mxu0 %v2596_v36 }
 0x1cb   :  { %1035 = vmatprep.subr.bf16.mxu0 %v2601_v20 }
 0x1ce   :  { %1036 = vmatpush1.bf16.msra.mxu0 %v2599_v39 }
 0x1cf   :  { %1037 = vmatprep.subr.bf16.mxu0 %v2604_v38 }
 0x1d2   :  { %1038 = vmatpush1.bf16.msra.mxu0 %v2602_v8 }
 0x1d3   :  { %1039 = vmatprep.subr.bf16.mxu0 %v2607_v16 }
 0x1d6   :  { %1040 = vmatpush1.bf16.msra.mxu0 %v2605_v41 }
 0x1d7   :  { %1041 = vmatprep.subr.bf16.mxu0 %v2610_v44  ;;  %v2635_v44 = vld [vmem:[#allocation9 + $0x4] ss:$8 sps:$4 sm:$0xff]  }
 0x1d8   :  { %1906 = vmatprep.subr.bf16.mxu1 %v2635_v44  ;;  %v2673_v44 = vld [vmem:[#allocation9 + $0xc0] ss:$8 sps:$4 sm:$0xff]  }
 0x1da   :  { %1042 = vmatpush1.bf16.msra.mxu0 %v2608_v46  ;;  %v2637_v46 = vld [vmem:[#allocation9] ss:$8 sps:$4 sm:$0xff]  }
 0x1db   :  { %1043 = vmatprep.subr.bf16.mxu0 %v2613_v47  ;;  %v2638_v47 = vld [vmem:[#allocation9 + $0x14] ss:$8 sps:$4 sm:$0xff]   ;;  %1907 = vmatpush1.bf16.msra.mxu1 %v2637_v46 }
 0x1dc   :  { %1908 = vmatprep.subr.bf16.mxu1 %v2638_v47 }
 0x1de   :  { %1044 = vmatpush1.bf16.msra.mxu0 %v2611_v40  ;;  %v2640_v40 = vld [vmem:[#allocation9 + $0x10] ss:$8 sps:$4 sm:$0xff]  }
 0x1df   :  { %1045 = vmatprep.subr.bf16.mxu0 %v2616_v48  ;;  %v2641_v48 = vld [vmem:[#allocation9 + $0x24] ss:$8 sps:$4 sm:$0xff]   ;;  %1909 = vmatpush1.bf16.msra.mxu1 %v2640_v40  ;;  %v2674_v40 = vld [vmem:[#allocation9 + $0xd4] ss:$8 sps:$4 sm:$0xff]  }
 0x1e0   :  { %1910 = vmatprep.subr.bf16.mxu1 %v2641_v48  ;;  %v2790_v48 = vld [vmem:[#allocation6 + $0x28] sm:$0xff] }
 0x1e2   :  { %1046 = vmatpush1.bf16.msra.mxu0 %v2614_v49  ;;  %v2643_v49 = vld [vmem:[#allocation9 + $0x20] ss:$8 sps:$4 sm:$0xff]  }
 0x1e3   :  { %1047 = vmatprep.subr.bf16.mxu0 %v2619_v50  ;;  %v2644_v50 = vld [vmem:[#allocation9 + $0x34] ss:$8 sps:$4 sm:$0xff]   ;;  %1911 = vmatpush1.bf16.msra.mxu1 %v2643_v49 }
 0x1e4   :  { %1912 = vmatprep.subr.bf16.mxu1 %v2644_v50 }
 0x1e6   :  { %1048 = vmatpush1.bf16.msra.mxu0 %v2617_v51  ;;  %v2646_v51 = vld [vmem:[#allocation9 + $0x30] ss:$8 sps:$4 sm:$0xff]  }
 0x1e7   :  { %1049 = vmatprep.subr.bf16.mxu0 %v2622_v52  ;;  %v2647_v52 = vld [vmem:[#allocation9 + $0x44] ss:$8 sps:$4 sm:$0xff]   ;;  %1913 = vmatpush1.bf16.msra.mxu1 %v2646_v51 }
 0x1e8   :  { %1914 = vmatprep.subr.bf16.mxu1 %v2647_v52 }
 0x1ea   :  { %1050 = vmatpush1.bf16.msra.mxu0 %v2620_v53  ;;  %v2649_v53 = vld [vmem:[#allocation9 + $0x40] ss:$8 sps:$4 sm:$0xff]  }
 0x1eb   :  { %1051 = vmatprep.subr.bf16.mxu0 %v2625_v54  ;;  %v2650_v54 = vld [vmem:[#allocation9 + $0x54] ss:$8 sps:$4 sm:$0xff]   ;;  %1915 = vmatpush1.bf16.msra.mxu1 %v2649_v53 }
 0x1ec   :  { %1916 = vmatprep.subr.bf16.mxu1 %v2650_v54  ;;  %v2791_v54 = vld [vmem:[#allocation6 + $0x30] sm:$0xff] }
 0x1ee   :  { %1052 = vmatpush1.bf16.msra.mxu0 %v2623_v55  ;;  %v2652_v55 = vld [vmem:[#allocation9 + $0x50] ss:$8 sps:$4 sm:$0xff]  }
 0x1ef   :  { %1053 = vmatprep.subr.bf16.mxu0 %v2628_v56  ;;  %v2653_v56 = vld [vmem:[#allocation9 + $0x64] ss:$8 sps:$4 sm:$0xff]   ;;  %1917 = vmatpush1.bf16.msra.mxu1 %v2652_v55 }
 0x1f0   :  { %1918 = vmatprep.subr.bf16.mxu1 %v2653_v56 }
 0x1f2   :  { %1054 = vmatpush1.bf16.msra.mxu0 %v2626_v57  ;;  %v2655_v57 = vld [vmem:[#allocation9 + $0x60] ss:$8 sps:$4 sm:$0xff]  }
 0x1f3   :  { %1055 = vmatprep.subr.bf16.mxu0 %v2631_v58  ;;  %v2656_v58 = vld [vmem:[#allocation9 + $0x74] ss:$8 sps:$4 sm:$0xff]   ;;  %1919 = vmatpush1.bf16.msra.mxu1 %v2655_v57  ;;  %v2676_v57 = vld [vmem:[#allocation9 + $0xd0] ss:$8 sps:$4 sm:$0xff]  }
 0x1f4   :  { %1920 = vmatprep.subr.bf16.mxu1 %v2656_v58 }
 0x1f6   :  { %1056 = vmatpush1.bf16.msra.mxu0 %v2629_v59  ;;  %v2658_v59 = vld [vmem:[#allocation9 + $0x70] ss:$8 sps:$4 sm:$0xff]  }
 0x1f7   :  { %1057 = vmatprep.subr.bf16.mxu0 %v2634_v60  ;;  %v2659_v60 = vld [vmem:[#allocation9 + $0x84] ss:$8 sps:$4 sm:$0xff]   ;;  %1921 = vmatpush1.bf16.msra.mxu1 %v2658_v59 }
 0x1f8   :  { %1922 = vmatprep.subr.bf16.mxu1 %v2659_v60 }
 0x1fa   :  { %1058 = vmatpush1.bf16.msra.mxu0 %v2632_v62  ;;  %v2661_v62 = vld [vmem:[#allocation9 + $0x80] ss:$8 sps:$4 sm:$0xff]  }
 0x1fb   :  { %1923 = vmatpush1.bf16.msra.mxu1 %v2661_v62 }
 0x1fc   :  { %1924 = vmatprep.subr.bf16.mxu1 %v2662_v63  ;;  %v2677_v63 = vld [vmem:[#allocation9 + $0xe4] ss:$8 sps:$4 sm:$0xff]  }
 0x1fd   :  { %1060 = vmatmul.mubr.bf16.vlgmr.msra.gmra.mrb[0].mxu0 %v3106_v42 }
 0x1fe   :  { %1069 = vmatprep.mubr.bf16.mxu0 %v3109_v43 }
 0x1ff   :  { %1925 = vmatpush1.bf16.msra.mxu1 %v2664_v3  ;;  %v2792_v3 = vld [vmem:[#allocation6 + $0x38] sm:$0xff] }
 0x200   :  { %1926 = vmatprep.subr.bf16.mxu1 %v2665_v5 }
 0x205   :  { %1070 = vmatmul.mubr.bf16.gmra.mrb[4].mxu0 %v3113_v45 }
 0x2d0   :  { %v1061_v11 = vpop.f32.mrb[0].mxu0 }
 0x2d1   :  { %v3140_v42 = vadd.f32 %v1061_v11, %v434_v9  ;;  %v1063_v43 = vpop.f32.mrb[1].mxu0 }
 0x2d2   :  { %v3142_v13 = vadd.f32 %v1063_v43, %v438_v10  ;;  %v1065_v45 = vpop.f32.mrb[2].mxu0 }
 0x2d3   :  { %v1098_v15 = vmul.f32 %v3140_v42, %v3140_v42  ;;  %v3146_v17 = vadd.f32 %v1065_v45, %v434_v9  ;;  %v1067_v18 = vpop.f32.mrb[3].mxu0 }
 0x2d4   :  { %v1082_v19 = vadd.f32 %v3142_v13, %v3140_v42  ;;  %v1099_v21 = vmul.f32 %v3142_v13, %v3142_v13  ;;  %v3152_v22 = vadd.f32 %v1067_v18, %v438_v10 }
 0x2d5   :  { %v1100_v23 = vmul.f32 %v3146_v17, %v3146_v17 }
 0x2d6   :  { %v1106_v24 = vadd.f32 %v1099_v21, %v1098_v15  ;;  %v1083_v25 = vadd.f32 %v3146_v17, %v1082_v19  ;;  %v1101_v29 = vmul.f32 %v3152_v22, %v3152_v22 }
 0x2d8   :  { %v1107_v27 = vadd.f32 %v1106_v24, %v1100_v23  ;;  %v1084_v28 = vadd.f32 %v3152_v22, %v1083_v25  ;;  %v1071_v30 = vpop.f32.mrb[4].mxu0 }
 0x2d9   :  { %v3160_v14 = vadd.f32 %v1071_v30, %v434_v9  ;;  %v1073_v31 = vpop.f32.mrb[5].mxu0 }
 0x2da   :  { %v1108_v32 = vadd.f32 %v1107_v27, %v1101_v29  ;;  %v3162_v26 = vadd.f32 %v1073_v31, %v438_v10  ;;  %v1075_v33 = vpop.f32.mrb[6].mxu0 }
 0x2db   :  { %v1085_v34 = vadd.f32 %v3160_v14, %v1084_v28  ;;  %v1102_v35 = vmul.f32 %v3160_v14, %v3160_v14  ;;  %v3167_v1 = vadd.f32 %v1075_v33, %v434_v9  ;;  %v1077_v37 = vpop.f32.mrb[7].mxu0  ;;  %v2667_v9 = vld [vmem:[#allocation9 + $0xa0] ss:$8 sps:$4 sm:$0xff]   ;;  %v2670_v33 = vld [vmem:[#allocation9 + $0xb0] ss:$8 sps:$4 sm:$0xff]  }
 0x2dc   :  { %v1103_v7 = vmul.f32 %v3162_v26, %v3162_v26  ;;  %v3174_v36 = vadd.f32 %v1077_v37, %v438_v10  ;;  %1927 = vmatpush1.bf16.msra.mxu1 %v2667_v9  ;;  %v2065_v28 = vld [vmem:[%s3345_s6] sm:$0x3] }
 0x2dd   :  { %v1109_v0 = vadd.f32 %v1108_v32, %v1102_v35  ;;  %v1086_v2 = vadd.f32 %v3162_v26, %v1085_v34  ;;  %v1104_v12 = vmul.f32 %v3167_v1, %v3167_v1  ;;  %v2071_v30 = vrot.slane %v2065_v28, %v3131_v4  ;;  %v2668_v32 = vld [vmem:[#allocation9 + $0xb4] ss:$8 sps:$4 sm:$0xff]   ;;  %v2671_v34 = vld [vmem:[#allocation9 + $0xc4] ss:$8 sps:$4 sm:$0xff]  }
 0x2de   :  { %v1105_v16 = vmul.f32 %v3174_v36, %v3174_v36  ;;  %v2075_v31 = vrot.slane %v2065_v28, %v3136_v6  ;;  %v2785_v37 = vld [vmem:[#allocation6] sm:$0xff]  ;;  %1928 = vmatprep.subr.bf16.mxu1 %v2668_v32  ;;  %v2682_v32 = vld [vmem:[#allocation9 + $0xf0] ss:$8 sps:$4 sm:$0xff]  }
 0x2df   :  { %v1087_v20 = vadd.f32 %v3167_v1, %v1086_v2  ;;  %v1110_v39 = vadd.f32 %v1109_v0, %v1103_v7  ;;  %v2078_v7 = vmul.f32 %v2785_v37, %v2071_v30  ;;  %v2786_v0 = vld [vmem:[#allocation6 + $0x8] sm:$0xff]  ;;  %v2084_v55 = vmul.f32 %v2791_v54, %v2071_v30 }
 0x2e0   :  { %v2079_v2 = vmul.f32 %v2786_v0, %v2075_v31  ;;  %1929 = vmatpush1.bf16.msra.mxu1 %v2670_v33  ;;  %v2083_v49 = vmul.f32 %v2790_v48, %v2075_v31  ;;  %v2085_v5 = vmul.f32 %v2792_v3, %v2075_v31  ;;  %v2685_v37 = vld [vmem:[#allocation9 + $0x104] ss:$8 sps:$4 sm:$0xff]  }
 0x2e1   :  { %v1088_v38 = vadd.f32 %v3174_v36, %v1087_v20  ;;  %v1111_v8 = vadd.f32 %v1110_v39, %v1104_v12  ;;  %v2787_v12 = vld [vmem:[#allocation6 + $0x10] sm:$0xff]  ;;  %v2066_v39 = vld [vmem:[%s3346_s7] sm:$0x3]  ;;  %1930 = vmatprep.subr.bf16.mxu1 %v2671_v34 }
 0x2e2   :  { %v2080_v20 = vmul.f32 %v2787_v12, %v2071_v30  ;;  %v2090_v46 = vrot.slane %v2066_v39, %v3131_v4  ;;  %v2094_v47 = vrot.slane %v2066_v39, %v3136_v6 }
 0x2e3   :  { %1089 = vadd.xlane.f32.xlu1 %v1088_v38  ;;  %v1112_v41 = vadd.f32 %v1111_v8, %v1105_v16  ;;  %v2788_v38 = vld [vmem:[#allocation6 + $0x18] sm:$0xff]  ;;  %v2789_v16 = vld [vmem:[#allocation6 + $0x20] sm:$0xff] }
 0x2e4   :  { %v2081_v8 = vmul.f32 %v2788_v38, %v2075_v31  ;;  %v3190_v50 = vadd.f32 %v2090_v46, %v2078_v7  ;;  %v3192_v51 = vadd.f32 %v2094_v47, %v2079_v2  ;;  %v3194_v52 = vadd.f32 %v2090_v46, %v2080_v20  ;;  %1931 = vmatpush1.bf16.msra.mxu1 %v2673_v44 }
 0x2e5   :  { %1932 = vmatprep.subr.bf16.mxu1 %v2674_v40  ;;  %v3208_v9 = vadd.f32 %v2094_v47, %v2083_v49 }
 0x2e6   :  { %v3196_v53 = vadd.f32 %v2094_v47, %v2081_v8  ;;  %v2107_v58 = vadd.f32 %v3192_v51, %v3190_v50  ;;  %v2123_v59 = vmul.f32 %v3190_v50, %v3190_v50  ;;  %v2124_v60 = vmul.f32 %v3192_v51, %v3192_v51 }
 0x2e7   :  { %1113 = vadd.xlane.f32.xlu1 %v1112_v41  ;;  %v2082_v41 = vmul.f32 %v2789_v16, %v2071_v30  ;;  %v2125_v62 = vmul.f32 %v3194_v52, %v3194_v52  ;;  %v1165_v8 = vstv %s2316_s11 }
 0x2e8   :  { %1933 = vmatpush1.bf16.msra.mxu1 %v2676_v57 }
 0x2e9   :  { %v3198_v56 = vadd.f32 %v2090_v46, %v2082_v41  ;;  %1934 = vmatprep.subr.bf16.mxu1 %v2677_v63 }
 0x370   :  { %v1090_v10 = vpop.xlane.xlu1 %1089 }
 0x371   :  { %v1091_v11 = vrot.slane %v1090_v10, 4 }
 0x373   :  { %v1092_v43 = vadd.f32 %v1091_v11, %v1090_v10  ;;  %v2108_v10 = vadd.f32 %v2107_v58, %v3194_v52  ;;  %v2126_v11 = vmul.f32 %v3196_v53, %v3196_v53 }
 0x374   :  { %v1114_v45 = vpop.xlane.xlu1 %1113 }
 0x375   :  { %v1093_v15 = vrot.slane %v1092_v43, 2  ;;  %v1115_v18 = vrot.slane %v1114_v45, 4 }
 0x377   :  { %v1116_v19 = vadd.f32 %v1115_v18, %v1114_v45  ;;  %v1094_v21 = vadd.f32 %v1093_v15, %v1092_v43  ;;  %v2131_v43 = vadd.f32 %v2124_v60, %v2123_v59  ;;  %v3213_v45 = vadd.f32 %v2090_v46, %v2084_v55  ;;  %v2679_v18 = vld [vmem:[#allocation9 + $0xe0] ss:$8 sps:$4 sm:$0xff]  }
 0x378   :  { %v2109_v15 = vadd.f32 %v2108_v10, %v3196_v53  ;;  %1935 = vmatpush1.bf16.msra.mxu1 %v2679_v18 }
 0x379   :  { %v1117_v23 = vrot.slane %v1116_v19, 2  ;;  %v1095_v24 = vrot.slane %v1094_v21, 1  ;;  %v2129_v30 = vmul.f32 %v3213_v45, %v3213_v45 }
 0x37b   :  { %v1096_v25 = vadd.f32 %v1095_v24, %v1094_v21  ;;  %v1118_v27 = vadd.f32 %v1117_v23, %v1116_v19  ;;  %v2127_v19 = vmul.f32 %v3198_v56, %v3198_v56  ;;  %v2132_v21 = vadd.f32 %v2131_v43, %v2125_v62  ;;  %v2680_v23 = vld [vmem:[#allocation9 + $0xf4] ss:$8 sps:$4 sm:$0xff]  }
 0x37c   :  { %v3218_v24 = vadd.f32 %v2094_v47, %v2085_v5  ;;  %1936 = vmatprep.subr.bf16.mxu1 %v2680_v23 }
 0x37d   :  { %2469 = vpush %v1096_v25  ;;  %v1119_v29 = vrot.slane %v1118_v27, 1  ;;  %v2110_v25 = vadd.f32 %v2109_v15, %v3198_v56  ;;  %v2133_v28 = vadd.f32 %v2132_v21, %v2126_v11  ;;  %1937 = vmatpush1.bf16.msra.mxu1 %v2682_v32 }
 0x37e   :  { %v2130_v34 = vmul.f32 %v3218_v24, %v3218_v24  ;;  %1959 = vmatprep.subr.bf16.mxu1 %v2685_v37 }
 0x37f   :  { %v1120_v35 = vadd.f32 %v1119_v29, %v1118_v27  ;;  %v2128_v27 = vmul.f32 %v3208_v9, %v3208_v9  ;;  %v2111_v29 = vadd.f32 %v2110_v25, %v3208_v9  ;;  %v2134_v31 = vadd.f32 %v2133_v28, %v2127_v19 }
 0x381   :  { %2471 = vpush %v1120_v35  ;;  %v2112_v33 = vadd.f32 %v2111_v29, %v3213_v45  ;;  %v2135_v35 = vadd.f32 %v2134_v31, %v2128_v27 }
 0x383   :  { %v2113_v7 = vadd.f32 %v2112_v33, %v3218_v24  ;;  %v2136_v0 = vadd.f32 %v2135_v35, %v2129_v30 }
 0x385   :  { %2114 = vadd.xlane.f32.xlu0 %v2113_v7  ;;  %v2137_v2 = vadd.f32 %v2136_v0, %v2130_v34  ;;  %v2683_v7 = vld [vmem:[#allocation9 + $0x100] ss:$8 sps:$4 sm:$0xff]  }
 0x387   :  { %2138 = vadd.xlane.f32.xlu1 %v2137_v2 }
 0x3ae   :  { %s2470_s6 = spop %2469 }
 0x3af   :  { %s1124_s7 = smul.f32 0.00012207031, %s2470_s6 }
 0x3b1   :  { %s1128_s30 = smul.f32 %s1124_s7, %s1124_s7 }
 0x3b2   :  { %s2472_s1 = spop %2471 }
 0x3b3   :  { %s1127_s28 = smul.f32 0.00012207031, %s2472_s1 }
 0x3b5   :  { %s1129_s4 = ssub.f32 %s1127_s28, %s1128_s30 }
 0x3b7   :  { %s1130_s15 = smax.f32 %s2907_s12, %s1129_s4 }
 0x3b8   :  { %s1131_s16 = sadd.f32 1e-05, %s1130_s15 }
 0x3ba   :  { %v1132_v12 = vstv %s1131_s16 }
 0x3bb   :  { %2781 = vrsqrt.f32 %v1132_v12 }
 0x3c5   :  { %v2782_v20 = vpop.eup %2781 }
 0x3c6   :  { %2473 = vpush %v2782_v20 }
 0x3f7   :  { %s2474_s13 = spop %2473 }
 0x3f8   :  { %s1135_s14 = smul.f32 %s2474_s13, %s2314_s9 }
 0x3fa   :  { %v1136_v39 = vstv %s1135_s14  ;;  %s1145_s17 = smul.f32 %s1135_s14, %s1124_s7 }
 0x3fb   :  { %v1138_v38 = vmul.f32 %v3142_v13, %v1136_v39  ;;  %v1140_v16 = vmul.f32 %v3152_v22, %v1136_v39  ;;  %v1137_v41 = vmul.f32 %v3140_v42, %v1136_v39  ;;  %v1139_v44 = vmul.f32 %v3146_v17, %v1136_v39 }
 0x3fc   :  { %s1146_s19 = ssub.f32 %s2315_s10, %s1145_s17  ;;  %v1142_v46 = vmul.f32 %v3162_v26, %v1136_v39  ;;  %v1144_v40 = vmul.f32 %v3174_v36, %v1136_v39  ;;  %v1141_v48 = vmul.f32 %v3160_v14, %v1136_v39  ;;  %v1143_v49 = vmul.f32 %v3167_v1, %v1136_v39  ;;  %v2688_v39 = vld [vmem:[#allocation9 + $0x114] ss:$8 sps:$4 sm:$0xff]  }
 0x3fe   :  { %v1147_v47 = vstv %s1146_s19 }
 0x3ff   :  { %v1149_v54 = vadd.f32 %v1147_v47, %v1138_v38  ;;  %v1151_v55 = vadd.f32 %v1147_v47, %v1140_v16  ;;  %v1148_v57 = vadd.f32 %v1147_v47, %v1137_v41  ;;  %v1150_v13 = vadd.f32 %v1147_v47, %v1139_v44 }
 0x400   :  { %v1153_v58 = vadd.f32 %v1147_v47, %v1142_v46  ;;  %v1155_v59 = vadd.f32 %v1147_v47, %v1144_v40  ;;  %v1152_v22 = vadd.f32 %v1147_v47, %v1141_v48  ;;  %v1154_v60 = vadd.f32 %v1147_v47, %v1143_v49  ;;  %v2686_v49 = vld [vmem:[#allocation9 + $0x110] ss:$8 sps:$4 sm:$0xff]  }
 0x401   :  { %vm1158_vm13 = vcmp.gt.f32.partialorder %v1149_v54, 0.0  ;;  %vm1160_vm14 = vcmp.gt.f32.partialorder %v1151_v55, 0.0  ;;  %v1167_v42 = vmul.f32 %v1165_v8, %v1149_v54  ;;  %v1169_v17 = vmul.f32 %v1165_v8, %v1151_v55 }
 0x402   :  { %vm1157_vm15 = vcmp.gt.f32.partialorder %v1148_v57, 0.0  ;;  %vm1159_vm0 = vcmp.gt.f32.partialorder %v1150_v13, 0.0  ;;  %v1166_v26 = vmul.f32 %v1165_v8, %v1148_v57  ;;  %v1168_v36 = vmul.f32 %v1165_v8, %v1150_v13 }
 0x403   :  { %v1175_v62 = vsel %vm1158_vm13, %v1149_v54, %v1167_v42  ;;  %v1177_v14 = vsel %vm1160_vm14, %v1151_v55, %v1169_v17  ;;  %vm1162_vm1 = vcmp.gt.f32.partialorder %v1153_v58, 0.0  ;;  %vm1164_vm2 = vcmp.gt.f32.partialorder %v1155_v59, 0.0  ;;  %v2689_v42 = vld [vmem:[#allocation9 + $0x120] ss:$8 sps:$4 sm:$0xff]  }
 0x404   :  { %v1183_v1 = vpack.c.bf16 %v1177_v14, %v1175_v62  ;;  %v1174_v63 = vsel %vm1157_vm15, %v1148_v57, %v1166_v26  ;;  %v1176_v3 = vsel %vm1159_vm0, %v1150_v13, %v1168_v36  ;;  %v1171_v5 = vmul.f32 %v1165_v8, %v1153_v58  ;;  %v2691_v13 = vld [vmem:[#allocation9 + $0x124] ss:$8 sps:$4 sm:$0xff]  }
 0x405   :  { %v1182_v10 = vpack.c.bf16 %v1176_v3, %v1174_v63  ;;  %v1173_v11 = vmul.f32 %v1165_v8, %v1155_v59  ;;  %vm1161_vm3 = vcmp.gt.f32.partialorder %v1152_v22, 0.0  ;;  %vm1163_vm4 = vcmp.gt.f32.partialorder %v1154_v60, 0.0  ;;  %v2694_v63 = vld [vmem:[#allocation9 + $0x134] ss:$8 sps:$4 sm:$0xff]  }
 0x406   :  { %v1190_v43 = vshrl.u32 %v1183_v1, 16  ;;  %v1207_v15 = vshll.u32 %v1183_v1, 16  ;;  %v1179_v18 = vsel %vm1162_vm1, %v1153_v58, %v1171_v5  ;;  %v1170_v19 = vmul.f32 %v1165_v8, %v1152_v22 }
 0x407   :  { %v1187_v21 = vshrl.u32 %v1182_v10, 16  ;;  %v1181_v23 = vsel %vm1164_vm2, %v1155_v59, %v1173_v11  ;;  %v1172_v25 = vmul.f32 %v1165_v8, %v1154_v60  ;;  %v1203_v32 = vshll.u32 %v1182_v10, 16 }
 0x408   :  { %v1206_v27 = vrot.slane %v1190_v43, 7  ;;  %v1185_v28 = vpack.c.bf16 %v1181_v23, %v1179_v18  ;;  %v1178_v29 = vsel %vm1161_vm3, %v1152_v22, %v1170_v19  ;;  %v1227_v30 = vrot.slane %v1207_v15, 7  ;;  %v2692_v18 = vld [vmem:[#allocation9 + $0x130] ss:$8 sps:$4 sm:$0xff]  }
 0x409   :  { %v1202_v31 = vrot.slane %v1187_v21, 7  ;;  %v1180_v33 = vsel %vm1163_vm4, %v1154_v60, %v1172_v25  ;;  %v1226_v40 = vrot.slane %v1203_v32, 7 }
 0x40a   :  { %v1209_v34 = vor.u32 %v1207_v15, %v1206_v27  ;;  %v1196_v35 = vshrl.u32 %v1185_v28, 16  ;;  %v1184_v37 = vpack.c.bf16 %v1180_v33, %v1178_v29  ;;  %v1215_v2 = vshll.u32 %v1185_v28, 16  ;;  %v2695_v29 = vld [vmem:[#allocation9 + $0x140] ss:$8 sps:$4 sm:$0xff]  }
 0x40b   :  { %v1205_v0 = vor.u32 %v1203_v32, %v1202_v31  ;;  %v1239_v44 = vsel %vm3061_vm10, %v1206_v27, %v1227_v30  ;;  %v3255_v17 = vsel %vm3061_vm10, %v1202_v31, %v1226_v40  ;;  %v2700_v30 = vld [vmem:[#allocation9 + $0x154] ss:$8 sps:$4 sm:$0xff]   ;;  %v2698_v31 = vld [vmem:[#allocation9 + $0x150] ss:$8 sps:$4 sm:$0xff]   ;;  %v2703_v32 = vld [vmem:[#allocation9 + $0x164] ss:$8 sps:$4 sm:$0xff]  }
 0x40c   :  { %v1235_v12 = vsel %vm3061_vm10, %v1190_v43, %v1209_v34  ;;  %v1214_v20 = vrot.slane %v1196_v35, 7  ;;  %v1193_v38 = vshrl.u32 %v1184_v37, 16  ;;  %v1211_v41 = vshll.u32 %v1184_v37, 16  ;;  %v2701_v37 = vld [vmem:[#allocation9 + $0x160] ss:$8 sps:$4 sm:$0xff]  }
 0x40d   :  { %v1257_v8 = vshll.u32 %v1235_v12, 16  ;;  %1938 = vmatprep.mubr.bf16.mxu1 %v1235_v12  ;;  %v3243_v16 = vsel %vm3061_vm10, %v1187_v21, %v1205_v0  ;;  %v1229_v48 = vrot.slane %v1215_v2, 7  ;;  %v1255_v55 = vshrl.u32 %v1235_v12, 16  ;;  %v2697_v21 = vld [vmem:[#allocation9 + $0x144] ss:$8 sps:$4 sm:$0xff]  }
 0x40e   :  { %1939 = vmatmul.mubr.bf16.vlgmr.msra.gmra.mrb[0].mxu1 %v3243_v16  ;;  %v1217_v46 = vor.u32 %v1215_v2, %v1214_v20  ;;  %v1210_v54 = vrot.slane %v1193_v38, 7  ;;  %v1262_v58 = vshll.u32 %v1239_v44, 16  ;;  %v1228_v22 = vrot.slane %v1211_v41, 7  ;;  %v2706_v2 = vld [vmem:[#allocation9 + $0x174] ss:$8 sps:$4 sm:$0xff]  }
 0x40f   :  { %v1259_v47 = vrot.slane %v1257_v8, 1  ;;  %1960 = vmatpush1.bf16.msra.mxu1 %v2683_v7  ;;  %v3259_v26 = vsel %vm3061_vm10, %v1214_v20, %v1229_v48  ;;  %v1305_v36 = vrot.slane %v1235_v12, 1  ;;  %v1302_v62 = vrot.slane %v3243_v16, 1 }
 0x410   :  { %v3250_v57 = vsel %vm3061_vm10, %v1196_v35, %v1217_v46  ;;  %1961 = vmatprep.subr.bf16.mxu1 %v2688_v39  ;;  %v1213_v59 = vor.u32 %v1211_v41, %v1210_v54  ;;  %v1264_v1 = vrot.slane %v1262_v58, 1  ;;  %v3268_v3 = vsel %vm3061_vm10, %v1210_v54, %v1228_v22  ;;  %v2704_v39 = vld [vmem:[#allocation9 + $0x170] ss:$8 sps:$4 sm:$0xff]   ;;  %v2709_v41 = vld [vmem:[#allocation9 + $0x184] ss:$8 sps:$4 sm:$0xff]  }
 0x411   :  { %1948 = vmatprep.mubr.bf16.mxu1 %v3250_v57  ;;  %v1260_v60 = vor.u32 %v1259_v47, %v1255_v55  ;;  %v1306_v5 = vrot.slane %v1239_v44, 1  ;;  %v1303_v11 = vrot.slane %v3255_v17, 1  ;;  %v1311_v43 = vrot.slane %v3250_v57, 1  ;;  %v2707_v47 = vld [vmem:[#allocation9 + $0x180] ss:$8 sps:$4 sm:$0xff]  }
 0x412   :  { %v3264_v14 = vsel %vm3061_vm10, %v1193_v38, %v1213_v59  ;;  %v1312_v15 = vrot.slane %v3259_v26, 1  ;;  %v1309_v27 = vrot.slane %v3268_v3, 1  ;;  %v2115_v33 = vpop.xlane.xlu0 %2114  ;;  %v2710_v55 = vld [vmem:[#allocation9 + $0x190] ss:$8 sps:$4 sm:$0xff]   ;;  %v2713_v58 = vld [vmem:[#allocation9 + $0x1a0] ss:$8 sps:$4 sm:$0xff]  }
 0x413   :  { %1962 = vmatpush1.bf16.msra.mxu1 %v2686_v49  ;;  %v1265_v10 = vsel %vm255_vm11, %v1260_v60, %v1264_v1  ;;  %v3276_v19 = vsel %vm316_vm12, %v1305_v36, %v1306_v5  ;;  %v1308_v61 = vrot.slane %v3264_v14, 1  ;;  %v3280_v23 = vsel %vm316_vm12, %v1302_v62, %v1303_v11  ;;  %v2712_v49 = vld [vmem:[#allocation9 + $0x194] ss:$8 sps:$4 sm:$0xff]   ;;  %v2716_v22 = vld [vmem:[#allocation9 + $0x1b0] ss:$8 sps:$4 sm:$0xff]  }
 0x414   :  { %1963 = vmatprep.subr.bf16.mxu1 %v2691_v13  ;;  %v3283_v25 = vsel %vm316_vm12, %v1311_v43, %v1312_v15  ;;  %v2116_v34 = vrot.slane %v2115_v33, 4  ;;  %v2139_v35 = vpop.xlane.xlu1 %2138  ;;  %v2715_v13 = vld [vmem:[#allocation9 + $0x1a4] ss:$8 sps:$4 sm:$0xff]   ;;  %v2718_v59 = vld [vmem:[#allocation9 + $0x1b4] ss:$8 sps:$4 sm:$0xff]   ;;  %v1281_v5 = vshll.u32 %v3250_v57, 16 }
 0x415   :  { %v3287_v28 = vsel %vm316_vm12, %v1308_v61, %v1309_v27  ;;  %v2140_v0 = vrot.slane %v2139_v35, 4  ;;  %v2721_v60 = vld [vmem:[#allocation9 + $0x1c4] ss:$8 sps:$4 sm:$0xff]   ;;  %v2724_v36 = vld [vmem:[#allocation9 + $0x1d4] ss:$8 sps:$4 sm:$0xff]   ;;  %v1279_v27 = vshrl.u32 %v3250_v57, 16 }
 0x416   :  { %1949 = vmatmul.mubr.bf16.gmra.mrb[4].mxu1 %v3264_v14  ;;  %v2117_v7 = vadd.f32 %v2116_v34, %v2115_v33  ;;  %v2722_v62 = vld [vmem:[#allocation9 + $0x1d0] ss:$8 sps:$4 sm:$0xff]   ;;  %v2727_v1 = vld [vmem:[#allocation9 + $0x1e4] ss:$8 sps:$4 sm:$0xff]   ;;  %v2730_v11 = vld [vmem:[#allocation9 + $0x1f4] ss:$8 sps:$4 sm:$0xff]  }
 0x417   :  { %1964 = vmatpush1.bf16.msra.mxu1 %v2689_v42  ;;  %1991 = vmatprep.mubr.bf16.mxu1 %v1265_v10  ;;  %v2141_v20 = vadd.f32 %v2140_v0, %v2139_v35  ;;  %v2719_v42 = vld [vmem:[#allocation9 + $0x1c0] ss:$8 sps:$4 sm:$0xff]   ;;  %v1283_v15 = vrot.slane %v1281_v5, 1  ;;  %v2728_v61 = vld [vmem:[#allocation9 + $0x1f0] ss:$8 sps:$4 sm:$0xff]  }
 0x418   :  { %1965 = vmatprep.subr.bf16.mxu1 %v2694_v63  ;;  %v2118_v12 = vrot.slane %v2117_v7, 2  ;;  %v1245_v63 = vshll.u32 %v3243_v16, 16  ;;  %v2725_v10 = vld [vmem:[#allocation9 + $0x1e0] ss:$8 sps:$4 sm:$0xff]   ;;  %v2772_v5 = vld [vmem:[#allocation9 + $0x2d4] ss:$8 sps:$4 sm:$0xff]  }
 0x419   :  { %v2142_v8 = vrot.slane %v2141_v20, 2  ;;  %v1284_v33 = vor.u32 %v1283_v15, %v1279_v27  ;;  %v2731_v35 = vld [vmem:[#allocation9 + $0x200] ss:$8 sps:$4 sm:$0xff]   ;;  %v2778_v15 = vld [vmem:[#allocation9 + $0x2f4] ss:$8 sps:$4 sm:$0xff]  }
 0x41a   :  { %v2119_v38 = vadd.f32 %v2118_v12, %v2117_v7  ;;  %v1247_v43 = vrot.slane %v1245_v63, 1  ;;  %v2739_v12 = vld [vmem:[#allocation9 + $0x224] ss:$8 sps:$4 sm:$0xff]   ;;  %v2767_v63 = vld [vmem:[#allocation9 + $0x2c0] ss:$8 sps:$4 sm:$0xff]  }
 0x41b   :  { %1966 = vmatpush1.bf16.msra.mxu1 %v2692_v18  ;;  %v2143_v44 = vadd.f32 %v2142_v8, %v2141_v20  ;;  %v1243_v18 = vshrl.u32 %v3243_v16, 16  ;;  %v2736_v16 = vld [vmem:[#allocation9 + $0x214] ss:$8 sps:$4 sm:$0xff]  }
 0x41c   :  { %1967 = vmatprep.subr.bf16.mxu1 %v2697_v21  ;;  %v2120_v46 = vrot.slane %v2119_v38, 1  ;;  %v1250_v21 = vshll.u32 %v3255_v17, 16  ;;  %v1267_v17 = vshrl.u32 %v3264_v14, 16  ;;  %v2742_v8 = vld [vmem:[#allocation9 + $0x234] ss:$8 sps:$4 sm:$0xff]  }
 0x41d   :  { %v2144_v48 = vrot.slane %v2143_v44, 1 }
 0x41e   :  { %v2121_v40 = vadd.f32 %v2120_v46, %v2119_v38  ;;  %v1252_v34 = vrot.slane %v1250_v21, 1  ;;  %v2737_v38 = vld [vmem:[#allocation9 + $0x220] ss:$8 sps:$4 sm:$0xff]  }
 0x41f   :  { %1968 = vmatpush1.bf16.msra.mxu1 %v2695_v29  ;;  %v2145_v54 = vadd.f32 %v2144_v48, %v2143_v44  ;;  %v2733_v29 = vld [vmem:[#allocation9 + $0x204] ss:$8 sps:$4 sm:$0xff]   ;;  %v2743_v46 = vld [vmem:[#allocation9 + $0x240] ss:$8 sps:$4 sm:$0xff]   ;;  %v2754_v48 = vld [vmem:[#allocation9 + $0x274] ss:$8 sps:$4 sm:$0xff]  }
 0x420   :  { %1969 = vmatprep.subr.bf16.mxu1 %v2700_v30  ;;  %2475 = vpush %v2121_v40  ;;  %v1286_v30 = vshll.u32 %v3259_v26, 16  ;;  %v2734_v26 = vld [vmem:[#allocation9 + $0x210] ss:$8 sps:$4 sm:$0xff]   ;;  %v2745_v44 = vld [vmem:[#allocation9 + $0x244] ss:$8 sps:$4 sm:$0xff]  }
 0x421   :  { %2477 = vpush %v2145_v54  ;;  %v2751_v40 = vld [vmem:[#allocation9 + $0x264] ss:$8 sps:$4 sm:$0xff]   ;;  %v1414_v21 = vld [vmem:[%s3344_s5] sm:$0x3]  ;;  %s2908_s5 = smov [#allocation10]  }
 0x422   :  { %v2757_v54 = vld [vmem:[#allocation9 + $0x284] ss:$8 sps:$4 sm:$0xff]   ;;  %v1419_v27 = vrot.slane %v1414_v21, %v3131_v4  ;;  %s2202_s28 = sshll.u32 %s2908_s5, 4  ;;  %s2203_s28 = int_to_ptr.vmem [resolvable:$true] %s2202_s28 }
 0x423   :  { %1970 = vmatpush1.bf16.msra.mxu1 %v2698_v31  ;;  %v1248_v31 = vor.u32 %v1247_v43, %v1243_v18  ;;  %v2773_v43 = vld [vmem:[#allocation9 + $0x2e0] ss:$8 sps:$4 sm:$0xff]   ;;  %v2776_v18 = vld [vmem:[#allocation9 + $0x2f0] ss:$8 sps:$4 sm:$0xff]   ;;  %s2869_s4 = scalar_lea.vmem %s2203_s28, 1024  ;;  %p2874_p0 = scmp.lt.s32.totalorder %s2203_s28, %s2203_s28 }
 0x424   :  { %1971 = vmatprep.subr.bf16.mxu1 %v2703_v32  ;;  %v1269_v32 = vshll.u32 %v3264_v14, 16  ;;  %v2740_v14 = vld [vmem:[#allocation9 + $0x230] ss:$8 sps:$4 sm:$0xff]   ;;  %p2870_p13 = scmp.ne.s32.totalorder %s2203_s28, %s2869_s4  ;;  %p2875_p1 = scmp.lt.s32.totalorder %s2869_s4, %s2869_s4 }
 0x425   :  { %v1253_v0 = vsel %vm255_vm11, %v1248_v31, %v1252_v34 }
 0x426   :  { %v1271_v7 = vrot.slane %v1269_v32, 1  ;;  %p2876_p2 = por %p2875_p1, %p2874_p0 }
 0x427   :  { %1972 = vmatpush1.bf16.msra.mxu1 %v2701_v37  ;;  %v1288_v37 = vrot.slane %v1286_v30, 1 }
 0x428   :  { %1973 = vmatprep.subr.bf16.mxu1 %v2706_v2  ;;  %v1274_v2 = vshll.u32 %v3268_v3, 16  ;;  %v1272_v20 = vor.u32 %v1271_v7, %v1267_v17  ;;  %v2748_v3 = vld [vmem:[#allocation9 + $0x254] ss:$8 sps:$4 sm:$0xff]   ;;  %p2877_p3 = pnand %p2876_p2, %p2870_p13 }
 0x429   :  { %v1289_v57 = vsel %vm255_vm11, %v1284_v33, %v1288_v37 }
 0x42b   :  { %1974 = vmatpush1.bf16.msra.mxu1 %v2704_v39  ;;  %v1276_v39 = vrot.slane %v1274_v2, 1 }
 0x42c   :  { %1975 = vmatprep.subr.bf16.mxu1 %v2709_v41 }
 0x42d   :  { %v1277_v41 = vsel %vm255_vm11, %v1272_v20, %v1276_v39 }
 0x42f   :  { %1976 = vmatpush1.bf16.msra.mxu1 %v2707_v47  ;;  %v2746_v47 = vld [vmem:[#allocation9 + $0x250] ss:$8 sps:$4 sm:$0xff]  }
 0x430   :  { %1977 = vmatprep.subr.bf16.mxu1 %v2712_v49  ;;  %v2752_v49 = vld [vmem:[#allocation9 + $0x270] ss:$8 sps:$4 sm:$0xff]  }
 0x433   :  { %1978 = vmatpush1.bf16.msra.mxu1 %v2710_v55 }
 0x434   :  { %1979 = vmatprep.subr.bf16.mxu1 %v2715_v13  ;;  %v2755_v13 = vld [vmem:[#allocation9 + $0x280] ss:$8 sps:$4 sm:$0xff]  }
 0x437   :  { %1980 = vmatpush1.bf16.msra.mxu1 %v2713_v58  ;;  %v2760_v58 = vld [vmem:[#allocation9 + $0x294] ss:$8 sps:$4 sm:$0xff]  }
 0x438   :  { %1981 = vmatprep.subr.bf16.mxu1 %v2718_v59  ;;  %v2758_v59 = vld [vmem:[#allocation9 + $0x290] ss:$8 sps:$4 sm:$0xff]  }
 0x43b   :  { %1982 = vmatpush1.bf16.msra.mxu1 %v2716_v22  ;;  %v2763_v22 = vld [vmem:[#allocation9 + $0x2a4] ss:$8 sps:$4 sm:$0xff]  }
 0x43c   :  { %1983 = vmatprep.subr.bf16.mxu1 %v2721_v60  ;;  %v2761_v60 = vld [vmem:[#allocation9 + $0x2a0] ss:$8 sps:$4 sm:$0xff]  }
 0x43f   :  { %1984 = vmatpush1.bf16.msra.mxu1 %v2719_v42 }
 0x440   :  { %1985 = vmatprep.subr.bf16.mxu1 %v2724_v36  ;;  %v2766_v36 = vld [vmem:[#allocation9 + $0x2b4] ss:$8 sps:$4 sm:$0xff]  }
 0x443   :  { %1986 = vmatpush1.bf16.msra.mxu1 %v2722_v62  ;;  %v2764_v62 = vld [vmem:[#allocation9 + $0x2b0] ss:$8 sps:$4 sm:$0xff]  }
 0x444   :  { %1987 = vmatprep.subr.bf16.mxu1 %v2727_v1  ;;  %v2769_v1 = vld [vmem:[#allocation9 + $0x2c4] ss:$8 sps:$4 sm:$0xff]  }
 0x447   :  { %1988 = vmatpush1.bf16.msra.mxu1 %v2725_v10  ;;  %v2770_v10 = vld [vmem:[#allocation9 + $0x2d0] ss:$8 sps:$4 sm:$0xff]  }
 0x448   :  { %1989 = vmatprep.subr.bf16.mxu1 %v2730_v11  ;;  %v2775_v11 = vld [vmem:[#allocation9 + $0x2e4] ss:$8 sps:$4 sm:$0xff]  }
 0x44b   :  { %1990 = vmatpush1.bf16.msra.mxu1 %v2728_v61 }
 0x44c   :  { %2012 = vmatprep.subr.bf16.mxu1 %v2733_v29 }
 0x44e   :  { %1992 = vmatmul.mubr.bf16.vlgmr.msra.gmra.mrb[0].mxu1 %v1253_v0 }
 0x44f   :  { %2001 = vmatprep.mubr.bf16.mxu1 %v1289_v57  ;;  %2013 = vmatpush1.bf16.msra.mxu1 %v2731_v35 }
 0x450   :  { %2014 = vmatprep.subr.bf16.mxu1 %v2736_v16 }
 0x451   :  { %s2476_s20 = spop %2475 }
 0x452   :  { %s3302_s21 = smul.f32 0.00012207031, %s2476_s20  ;;  %s2478_s22 = spop %2477 }
 0x453   :  { %2015 = vmatpush1.bf16.msra.mxu1 %v2734_v26  ;;  %s2152_s24 = smul.f32 0.00012207031, %s2478_s22 }
 0x454   :  { %2016 = vmatprep.subr.bf16.mxu1 %v2739_v12  ;;  %s2153_s23 = smul.f32 %s3302_s21, %s3302_s21 }
 0x456   :  { %2002 = vmatmul.mubr.bf16.gmra.mrb[4].mxu1 %v1277_v41  ;;  %s2154_s25 = ssub.f32 %s2152_s24, %s2153_s23 }
 0x457   :  { %2017 = vmatpush1.bf16.msra.mxu1 %v2737_v38  ;;  %2044 = vmatprep.mubr.bf16.mxu1 %v3276_v19  ;;  %v2749_v19 = vld [vmem:[#allocation9 + $0x260] ss:$8 sps:$4 sm:$0xff]  }
 0x458   :  { %2018 = vmatprep.subr.bf16.mxu1 %v2742_v8  ;;  %s2155_s26 = smax.f32 %s2907_s12, %s2154_s25  ;;  %s2413_s12 = sld [smem:[#allocation2 + $0x6]] }
 0x459   :  { %s2156_s3 = sadd.f32 1e-05, %s2155_s26 }
 0x45b   :  { %2019 = vmatpush1.bf16.msra.mxu1 %v2740_v14  ;;  %v2157_v55 = vstv %s2156_s3 }
 0x45c   :  { %2020 = vmatprep.subr.bf16.mxu1 %v2745_v44  ;;  %2783 = vrsqrt.f32 %v2157_v55 }
 0x45f   :  { %2021 = vmatpush1.bf16.msra.mxu1 %v2743_v46 }
 0x460   :  { %2022 = vmatprep.subr.bf16.mxu1 %v2748_v3 }
 0x463   :  { %2023 = vmatpush1.bf16.msra.mxu1 %v2746_v47 }
 0x464   :  { %2024 = vmatprep.subr.bf16.mxu1 %v2751_v40 }
 0x466   :  { %v2784_v42 = vpop.eup %2783 }
 0x467   :  { %2025 = vmatpush1.bf16.msra.mxu1 %v2749_v19  ;;  %2479 = vpush %v2784_v42 }
 0x468   :  { %2026 = vmatprep.subr.bf16.mxu1 %v2754_v48 }
 0x46b   :  { %2027 = vmatpush1.bf16.msra.mxu1 %v2752_v49 }
 0x46c   :  { %2028 = vmatprep.subr.bf16.mxu1 %v2757_v54 }
 0x46f   :  { %2029 = vmatpush1.bf16.msra.mxu1 %v2755_v13 }
 0x470   :  { %2030 = vmatprep.subr.bf16.mxu1 %v2760_v58 }
 0x473   :  { %2031 = vmatpush1.bf16.msra.mxu1 %v2758_v59 }
 0x474   :  { %2032 = vmatprep.subr.bf16.mxu1 %v2763_v22 }
 0x477   :  { %2033 = vmatpush1.bf16.msra.mxu1 %v2761_v60 }
 0x478   :  { %2034 = vmatprep.subr.bf16.mxu1 %v2766_v36 }
 0x47b   :  { %2035 = vmatpush1.bf16.msra.mxu1 %v2764_v62 }
 0x47c   :  { %2036 = vmatprep.subr.bf16.mxu1 %v2769_v1 }
 0x47f   :  { %2037 = vmatpush1.bf16.msra.mxu1 %v2767_v63 }
 0x480   :  { %2038 = vmatprep.subr.bf16.mxu1 %v2772_v5 }
 0x483   :  { %2039 = vmatpush1.bf16.msra.mxu1 %v2770_v10 }
 0x484   :  { %2040 = vmatprep.subr.bf16.mxu1 %v2775_v11 }
 0x487   :  { %2041 = vmatpush1.bf16.msra.mxu1 %v2773_v43 }
 0x488   :  { %2042 = vmatprep.subr.bf16.mxu1 %v2778_v15 }
 0x48b   :  { %2043 = vmatpush1.bf16.msra.mxu1 %v2776_v18 }
 0x48e   :  { %2045 = vmatmul.mubr.bf16.vlgmr.msra.gmra.mrb[0].mxu1 %v3280_v23 }
 0x48f   :  { %2054 = vmatprep.mubr.bf16.mxu1 %v3283_v25  ;;  %v1423_v25 = vrot.slane %v1414_v21, %v3136_v6 }
 0x496   :  { %2055 = vmatmul.mubr.bf16.gmra.mrb[4].mxu1 %v3287_v28 }
 0x498   :  { %s2480_s27 = spop %2479 }
 0x499   :  { %s2160_s2 = smul.f32 %s2480_s27, %s2413_s12 }
 0x49b   :  { %s2170_s6 = smul.f32 %s2160_s2, %s3302_s21  ;;  %v2161_v61 = vstv %s2160_s2 }
 0x49c   :  { %v2162_v29 = vmul.f32 %v2161_v61, %v3190_v50  ;;  %v2163_v28 = vmul.f32 %v2161_v61, %v3192_v51  ;;  %v2164_v30 = vmul.f32 %v2161_v61, %v3194_v52  ;;  %v2165_v32 = vmul.f32 %v2161_v61, %v3196_v53 }
 0x49d   :  { %s2171_s7 = ssub.f32 %s2414_s29, %s2170_s6  ;;  %v2166_v52 = vmul.f32 %v2161_v61, %v3198_v56  ;;  %v2167_v53 = vmul.f32 %v2161_v61, %v3208_v9  ;;  %v2168_v12 = vmul.f32 %v2161_v61, %v3213_v45  ;;  %v2169_v39 = vmul.f32 %v2161_v61, %v3218_v24 }
 0x49f   :  { %v2172_v23 = vstv %s2171_s7 }
 0x4a0   :  { %v2173_v34 = vadd.f32 %v2172_v23, %v2162_v29  ;;  %v2174_v16 = vadd.f32 %v2172_v23, %v2163_v28  ;;  %v2175_v57 = vadd.f32 %v2172_v23, %v2164_v30  ;;  %v2176_v6 = vadd.f32 %v2172_v23, %v2165_v32 }
 0x4a1   :  { %v2177_v8 = vadd.f32 %v2172_v23, %v2166_v52  ;;  %v2178_v44 = vadd.f32 %v2172_v23, %v2167_v53  ;;  %v2179_v56 = vadd.f32 %v2172_v23, %v2168_v12  ;;  %v2180_v48 = vadd.f32 %v2172_v23, %v2169_v39 }
 0x561   :  { %v2046_v31 = vpop.f32.mrb[0].mxu1 }
 0x562   :  { %v2423_v33 = vadd.f32 %v2046_v31, %v1419_v27  ;;  %v2048_v35 = vpop.f32.mrb[1].mxu1 }
 0x563   :  { %v2424_v37 = vadd.f32 %v2048_v35, %v1423_v25  ;;  %v2050_v7 = vpop.f32.mrb[2].mxu1 }
 0x564   :  { %v2181_v0 = vadd.f32 %v2423_v33, %v2173_v34  ;;  %v2425_v4 = vadd.f32 %v2050_v7, %v1419_v27  ;;  %v2052_v50 = vpop.f32.mrb[3].mxu1 }
 0x565   :  { %v2182_v17 = vadd.f32 %v2424_v37, %v2174_v16  ;;  %v2426_v26 = vadd.f32 %v2052_v50, %v1423_v25 }
 0x566   :  { %2189 = vst [vmem:[#allocation10] sm:$0xff] %v2181_v0  ;;  %v2183_v51 = vadd.f32 %v2425_v4, %v2175_v57 }
 0x567   :  { %2190 = vst [vmem:[#allocation10 + $0x8] sm:$0xff] %v2182_v17  ;;  %v2184_v2 = vadd.f32 %v2426_v26, %v2176_v6 }
 0x568   :  { %2191 = vst [vmem:[#allocation10 + $0x10] sm:$0xff] %v2183_v51 }
 0x569   :  { %2192 = vst [vmem:[#allocation10 + $0x18] sm:$0xff] %v2184_v2  ;;  %v2056_v20 = vpop.f32.mrb[4].mxu1 }
 0x56a   :  { %v2427_v38 = vadd.f32 %v2056_v20, %v1419_v27  ;;  %v2058_v41 = vpop.f32.mrb[5].mxu1 }
 0x56b   :  { %v2428_v14 = vadd.f32 %v2058_v41, %v1423_v25  ;;  %v2060_v46 = vpop.f32.mrb[6].mxu1 }
 0x56c   :  { %v2185_v3 = vadd.f32 %v2427_v38, %v2177_v8  ;;  %v2429_v47 = vadd.f32 %v2060_v46, %v1419_v27  ;;  %v2062_v40 = vpop.f32.mrb[7].mxu1 }
 0x56d   :  { %v2186_v9 = vadd.f32 %v2428_v14, %v2178_v44  ;;  %v2430_v19 = vadd.f32 %v2062_v40, %v1423_v25 }
 0x56e   :  { %2193 = vst [vmem:[#allocation10 + $0x20] sm:$0xff] %v2185_v3  ;;  %v2187_v45 = vadd.f32 %v2429_v47, %v2179_v56 }
 0x56f   :  { %2194 = vst [vmem:[#allocation10 + $0x28] sm:$0xff] %v2186_v9  ;;  %v2188_v49 = vadd.f32 %v2430_v19, %v2180_v48 }
 0x570   :  { %2195 = vst [vmem:[#allocation10 + $0x30] sm:$0xff] %v2187_v45 }
 0x571   :  { %2196 = vst [vmem:[#allocation10 + $0x38] sm:$0xff] %v2188_v49 }
 0x572   :  { %2880 = shalt.err (!%p2877_p3)
}
 0x573   :  { %s2881_s9 = scalar_lea.hbm %s3347_s8, 1024 }
 0x574   :  { %p2882_p4 = scmp.ne.s32.totalorder %s3347_s8, %s2881_s9  ;;  %p2885_p5 = scmp.lt.u32.totalorder %s2881_s9, %s3347_s8 }
 0x576   :  { %p2887_p6 = pnand %p2885_p5, %p2882_p4 }
 0x578   :  { %2890 = shalt.err (!%p2887_p6)
}
 0x579   :  { %2208 = dma.vmem_to_hbm [thread:$0]  %s2203_s28, 1024, %s3347_s8, [#allocation4], %s2904_s0, %s2904_s0, %s2905_s18  }
 0x57a   :  { %2897 = dma.done.wait [#allocation4], 1024  }
 0x57b   :  { %2898 = vsyncadd [#allocation4], 4294966272 }
 0x57c   :  { %2212 = vsyncpa [#allocation3], 1 }
 0x57d   :  { %2213 = vsyncpa [#allocation8], 1 }
 0x57e   :  { %2214 = vsyncpa [#allocation4], 1 }
 0x57f   :  { %2215 = vsyncpa [#allocation5], 1 }

</bundles_post_ra>
